<compile_context>
chip_gen: v7x
topology: tpu7x:2x2x1
jax: 0.10.0
libtpu: 0.0.40
codegen_flags: <defaults>
</compile_context>

<pallas_src>
import jax
import jax.numpy as jnp
from jax import lax
from jax.experimental import pallas as pl
from jax.experimental.pallas import tpu as pltpu


def _lstm_kernel(len_ref, x_ref, wih_ref, whh_ref, bias_ref,
                 o_ref, hn_ref, cn_ref,
                 h_sc, c_sc, xg_sc):
    """One (batch-tile, time-chunk) grid step.

    len_ref:  (BT, 1)  int32   valid sequence length per row
    x_ref:    (TC, BT, D) f32  time-major input chunk
    wih_ref:  (D, 4H)  f32     W_ih^T with g-gate columns pre-scaled by 2
    whh_ref:  (H, 4H)  f32     W_hh^T with g-gate columns pre-scaled by 2
    bias_ref: (1, 4H)  f32     (b_ih + b_hh) with g-gate part pre-scaled by 2
    o_ref:    (TC, BT, H)      per-step outputs (0 past the valid length)
    hn_ref:   (BT, H)          final hidden state (last valid step)
    cn_ref:   (BT, H)          final cell state   (last valid step)
    h_sc/c_sc:(BT, H)  f32     state carried across time chunks
    xg_sc:    (TC, BT, 4H) f32 per-chunk precomputed input projection
    """
    t_chunk = pl.program_id(1)
    TC, BT, D = x_ref.shape
    H = hn_ref.shape[1]
    H4 = 4 * H

    # Zero-init the carried state at the first time chunk of each batch tile.
    @pl.when(t_chunk == 0)
    def _():
        h_sc[...] = jnp.zeros_like(h_sc)
        c_sc[...] = jnp.zeros_like(c_sc)

    # Bulk input projection for this chunk: one MXU matmul, off the serial path.
    xg = jnp.dot(x_ref[...].reshape(TC * BT, D), wih_ref[...],
                 preferred_element_type=jnp.float32)
    xg_sc[...] = (xg + bias_ref[...]).reshape(TC, BT, H4)

    whh = whh_ref[...]                                # (H, 4H), hoisted to vregs
    lengths = len_ref[...]                            # (BT, 1) int32
    t0 = t_chunk * TC

    # Lane mask selecting the g-gate (tanh) region of the (BT, 4H) gate tile.
    lane = lax.broadcasted_iota(jnp.int32, (BT, H4), 1)
    g_region = (lane >= 2 * H) & (lane < 3 * H)

    def step(tt, carry):
        h, c = carry                                  # (BT, H) each
        # gates = x-projection (incl. bias, g cols pre-doubled) + h @ W_hh^T
        gates = xg_sc[tt] + jnp.dot(h, whh, preferred_element_type=jnp.float32)

        # Single full-width EUP pass: tanh(z) = 2*sigmoid(2z) - 1 (2 pre-folded).
        sig = jax.nn.sigmoid(gates)
        acts = jnp.where(g_region, 2.0 * sig - 1.0, sig)    # (BT, 4H)

        i_g = acts[:, 0 * H:1 * H]
        f_g = acts[:, 1 * H:2 * H]
        g_g = acts[:, 2 * H:3 * H]
        o_g = acts[:, 3 * H:4 * H]

        c_new = f_g * c + i_g * g_g
        h_new = o_g * jnp.tanh(c_new)

        # Prefix mask: freeze state past the valid length, zero padded outputs.
        m = (t0 + tt) < lengths                        # (BT, 1) bool
        h_next = jnp.where(m, h_new, h)
        c_next = jnp.where(m, c_new, c)
        o_ref[tt] = jnp.where(m, h_new, 0.0).astype(o_ref.dtype)
        return h_next, c_next

    h_f, c_f = lax.fori_loop(0, TC, step, (h_sc[...], c_sc[...]), unroll=True)

    # Carry state to the next chunk and (re)write the final-state outputs; the
    # hn/cn blocks stay VMEM-resident across the time axis, so only the value
    # from the last chunk is DMA'd back.
    h_sc[...] = h_f
    c_sc[...] = c_f
    hn_ref[...] = h_f.astype(hn_ref.dtype)
    cn_ref[...] = c_f.astype(cn_ref.dtype)


@jax.jit
def masked_lstm(x, mask, w_ih, w_hh, b_ih, b_hh):
    """x: (B, T, D) float32, mask: (B, T) {0,1} prefix mask (or None).

    Returns (output (B, T, H), (hn (1, B, H), cn (1, B, H))).
    """
    B, T, D = x.shape
    H4 = w_ih.shape[0]
    H = H4 // 4

    BT = 8            # batch tile (sublane width); bump for production batches
    TC = 8            # time chunk; recurrence fully unrolled within a chunk

    Bp = ((B + BT - 1) // BT) * BT
    Tp = ((T + TC - 1) // TC) * TC

    if mask is None:
        mask = jnp.ones((B, T), jnp.float32)
    # Exactly what the PyTorch module does: lengths = mask.sum(dim=1).
    lengths = jnp.sum(mask.astype(jnp.int32), axis=1)                 # (B,)
    lengths_p = jnp.pad(lengths, (0, Bp - B))[:, None]                # (Bp, 1)

    # Time-major padded input (padded rows/steps have length 0 -> frozen zeros).
    x_p = jnp.pad(x.astype(jnp.float32), ((0, Bp - B), (0, Tp - T), (0, 0)))
    x_tm = jnp.transpose(x_p, (1, 0, 2))                              # (Tp, Bp, D)

    # Fold tanh(z) = 2*sigmoid(2z) - 1 into the g-gate columns (scale by 2).
    g_scale = jnp.concatenate([jnp.ones((2 * H,), jnp.float32),
                               jnp.full((H,), 2.0, jnp.float32),
                               jnp.ones((H,), jnp.float32)])          # (4H,)
    wih_t = (w_ih.T * g_scale[None, :]).astype(jnp.float32)           # (D, 4H)
    whh_t = (w_hh.T * g_scale[None, :]).astype(jnp.float32)           # (H, 4H)
    bias = ((b_ih + b_hh) * g_scale)[None, :].astype(jnp.float32)     # (1, 4H)

    out_t, hn_p, cn_p = pl.pallas_call(
        _lstm_kernel,
        out_shape=(
            jax.ShapeDtypeStruct((Tp, Bp, H), x.dtype),
            jax.ShapeDtypeStruct((Bp, H), x.dtype),
            jax.ShapeDtypeStruct((Bp, H), x.dtype),
        ),
        grid_spec=pltpu.PrefetchScalarGridSpec(
            num_scalar_prefetch=0,
            grid=(Bp // BT, Tp // TC),
            in_specs=[
                pl.BlockSpec((BT, 1), lambda b, t: (b, 0)),            # lengths
                pl.BlockSpec((TC, BT, D), lambda b, t: (t, b, 0)),     # x chunk
                pl.BlockSpec((D, H4), lambda b, t: (0, 0)),            # W_ih^T
                pl.BlockSpec((H, H4), lambda b, t: (0, 0)),            # W_hh^T
                pl.BlockSpec((1, H4), lambda b, t: (0, 0)),            # bias
            ],
            out_specs=[
                pl.BlockSpec((TC, BT, H), lambda b, t: (t, b, 0)),     # outputs
                pl.BlockSpec((BT, H), lambda b, t: (b, 0)),            # hn
                pl.BlockSpec((BT, H), lambda b, t: (b, 0)),            # cn
            ],
            scratch_shapes=[
                pltpu.VMEM((BT, H), jnp.float32),       # h carry
                pltpu.VMEM((BT, H), jnp.float32),       # c carry
                pltpu.VMEM((TC, BT, H4), jnp.float32),  # per-chunk x projection
            ],
        ),
        compiler_params=pltpu.CompilerParams(
            dimension_semantics=("parallel", "arbitrary"),
            vmem_limit_bytes=32 * 1024 * 1024,
        ),
    )(lengths_p, x_tm, wih_t, whh_t, bias)

    output = jnp.transpose(out_t, (1, 0, 2))[:B, :T]                  # (B, T, H)
    hn = hn_p[:B][None]                                               # (1, B, H)
    cn = cn_p[:B][None]                                               # (1, B, H)
    return output, (hn, cn)


def _lstm_reference(x, mask, w_ih, w_hh, b_ih, b_hh):
    """Pure-JAX lax.scan reference of the masked LSTM (PyTorch semantics)."""
    B, T, D = x.shape
    H = w_hh.shape[1]
    b = (b_ih + b_hh)

    def step(carry, inp):
        h, c = carry
        xt, mt = inp                                 # (B, D), (B,)
        gates = xt @ w_ih.T + h @ w_hh.T + b         # (B, 4H)
        i = jax.nn.sigmoid(gates[:, 0 * H:1 * H])
        f = jax.nn.sigmoid(gates[:, 1 * H:2 * H])
        g = jnp.tanh(gates[:, 2 * H:3 * H])
        o = jax.nn.sigmoid(gates[:, 3 * H:4 * H])
        c_new = f * c + i * g
        h_new = o * jnp.tanh(c_new)
        m = mt[:, None]
        h_next = m * h_new + (1.0 - m) * h
        c_next = m * c_new + (1.0 - m) * c
        return (h_next, c_next), m * h_new

    init = (jnp.zeros((B, H), jnp.float32), jnp.zeros((B, H), jnp.float32))
    (hn, cn), out_t = lax.scan(step, init,
                               (jnp.transpose(x, (1, 0, 2)),
                                jnp.transpose(mask.astype(jnp.float32), (1, 0))))
    return jnp.transpose(out_t, (1, 0, 2)), (hn[None], cn[None])


if __name__ == "__main__":
    # small shapes implied by the module: batch=2, seq=8, input_size=16, hidden=32
    B, T, D, H = 2, 8, 16, 32

    key = jax.random.PRNGKey(0)
    k_x, k1, k2, k3, k4 = jax.random.split(key, 5)

    # deterministic parameter init, mimicking nn.LSTM's U(-1/sqrt(H), 1/sqrt(H))
    bound = 1.0 / jnp.sqrt(jnp.float32(H))
    w_ih = jax.random.uniform(k1, (4 * H, D), jnp.float32, -bound, bound)
    w_hh = jax.random.uniform(k2, (4 * H, H), jnp.float32, -bound, bound)
    b_ih = jax.random.uniform(k3, (4 * H,), jnp.float32, -bound, bound)
    b_hh = jax.random.uniform(k4, (4 * H,), jnp.float32, -bound, bound)

    x = jax.random.normal(k_x, (B, T, D), jnp.float32)
    # valid-prefix mask; one full-length sequence so padded output length == T
    lengths = jnp.array([T, 5], dtype=jnp.int32)
    mask = (jnp.arange(T)[None, :] < lengths[:, None]).astype(jnp.float32)  # (B, T)

    out, (hn, cn) = masked_lstm(x, mask, w_ih, w_hh, b_ih, b_hh)
    jax.block_until_ready((out, hn, cn))

    out_ref, (hn_ref, cn_ref) = _lstm_reference(x, mask, w_ih, w_hh, b_ih, b_hh)
    assert out.shape == (B, T, H) and hn.shape == (1, B, H) and cn.shape == (1, B, H)
    assert jnp.allclose(out, out_ref, atol=1e-5, rtol=1e-5)
    assert jnp.allclose(hn, hn_ref, atol=1e-5, rtol=1e-5)
    assert jnp.allclose(cn, cn_ref, atol=1e-5, rtol=1e-5)

    print("KERNEL_OK")
</pallas_src>

<mosaic_0001>
module attributes {stable_mosaic.version = 11 : i64} {
  func.func @_lstm_kernel(%arg0: i32, %arg1: i32, %arg2: memref<8x1xi32, #tpu.memory_space<vmem>>, %arg3: memref<8x8x16xf32, #tpu.memory_space<vmem>>, %arg4: memref<16x128xf32, #tpu.memory_space<vmem>>, %arg5: memref<32x128xf32, #tpu.memory_space<vmem>>, %arg6: memref<1x128xf32, #tpu.memory_space<vmem>>, %arg7: memref<8x8x32xf32, #tpu.memory_space<vmem>>, %arg8: memref<8x32xf32, #tpu.memory_space<vmem>>, %arg9: memref<8x32xf32, #tpu.memory_space<vmem>>, %arg10: memref<8x32xf32, #tpu.memory_space<vmem>>, %arg11: memref<8x32xf32, #tpu.memory_space<vmem>>, %arg12: memref<8x8x128xf32, #tpu.memory_space<vmem>>) attributes {dimension_semantics = [#tpu.dimension_semantics<parallel>, #tpu.dimension_semantics<arbitrary>], iteration_bounds = array<i64: 1, 1>, scalar_prefetch = 0 : i64, scratch_operands = 3 : i64, tpu.core_type = #tpu.core_type<tc>, window_params = [{transform_indices = @transform_0, window_bounds = array<i64: 8, 1>}, {transform_indices = @transform_1, window_bounds = array<i64: 8, 8, 16>}, {pipeline_mode = #tpu.pipeline_mode<synchronous>, transform_indices = @transform_2, window_bounds = array<i64: 16, 128>}, {pipeline_mode = #tpu.pipeline_mode<synchronous>, transform_indices = @transform_3, window_bounds = array<i64: 32, 128>}, {pipeline_mode = #tpu.pipeline_mode<synchronous>, transform_indices = @transform_4, window_bounds = array<i64: 1, 128>}, {transform_indices = @transform_5, window_bounds = array<i64: 8, 8, 32>}, {transform_indices = @transform_6, window_bounds = array<i64: 8, 32>}, {transform_indices = @transform_7, window_bounds = array<i64: 8, 32>}]} {
    %c0_i32 = arith.constant 0 : i32
    %0 = arith.cmpi eq, %arg1, %c0_i32 : i32
    %1 = arith.extui %0 : i1 to i32
    %c0_i32_0 = arith.constant 0 : i32
    %2 = arith.cmpi ne, %1, %c0_i32_0 : i32
    scf.if %2 {
      %cst_100 = arith.constant 0.000000e+00 : f32
      %355 = vector.broadcast %cst_100 : f32 to vector<8x32xf32>
      %c0_101 = arith.constant 0 : index
      %c0_102 = arith.constant 0 : index
      %356 = vector.load %arg10[%c0_101, %c0_102] : memref<8x32xf32, #tpu.memory_space<vmem>>, vector<8x32xf32>
      tpu.vector_store %arg10[%c0_101, %c0_102], %355 {strides = array<i32>} : memref<8x32xf32, #tpu.memory_space<vmem>>, vector<8x32xf32>,
      %cst_103 = arith.constant 0.000000e+00 : f32
      %357 = vector.broadcast %cst_103 : f32 to vector<8x32xf32>
      %c0_104 = arith.constant 0 : index
      %c0_105 = arith.constant 0 : index
      %358 = vector.load %arg11[%c0_104, %c0_105] : memref<8x32xf32, #tpu.memory_space<vmem>>, vector<8x32xf32>
      tpu.vector_store %arg11[%c0_104, %c0_105], %357 {strides = array<i32>} : memref<8x32xf32, #tpu.memory_space<vmem>>, vector<8x32xf32>,
    } else {
    }
    %c0 = arith.constant 0 : index
    %c0_1 = arith.constant 0 : index
    %c0_2 = arith.constant 0 : index
    %3 = vector.load %arg3[%c0, %c0_1, %c0_2] : memref<8x8x16xf32, #tpu.memory_space<vmem>>, vector<8x8x16xf32>
    %4 = vector.shape_cast %3 : vector<8x8x16xf32> to vector<64x16xf32>
    %c0_3 = arith.constant 0 : index
    %c0_4 = arith.constant 0 : index
    %5 = vector.load %arg4[%c0_3, %c0_4] : memref<16x128xf32, #tpu.memory_space<vmem>>, vector<16x128xf32>
    %cst = arith.constant dense<0.000000e+00> : vector<64x128xf32>
    %6 = tpu.matmul %4, %5, %cst {dimension_numbers = #tpu.dot_dimension_numbers<[1], [0], [0], [1], [0, 0, 1, 1], [], []>} : vector<64x16xf32>, vector<16x128xf32>, vector<64x128xf32> -> vector<64x128xf32>
    %c0_5 = arith.constant 0 : index
    %c0_6 = arith.constant 0 : index
    %7 = vector.load %arg6[%c0_5, %c0_6] : memref<1x128xf32, #tpu.memory_space<vmem>>, vector<1x128xf32>
    %8 = vector.broadcast %7 : vector<1x128xf32> to vector<64x128xf32>
    %9 = arith.addf %6, %8 : vector<64x128xf32>
    %10 = vector.shape_cast %9 : vector<64x128xf32> to vector<8x8x128xf32>
    %c0_7 = arith.constant 0 : index
    %c0_8 = arith.constant 0 : index
    %c0_9 = arith.constant 0 : index
    %11 = vector.load %arg12[%c0_7, %c0_8, %c0_9] : memref<8x8x128xf32, #tpu.memory_space<vmem>>, vector<8x8x128xf32>
    tpu.vector_store %arg12[%c0_7, %c0_8, %c0_9], %10 {strides = array<i32>} : memref<8x8x128xf32, #tpu.memory_space<vmem>>, vector<8x8x128xf32>,
    %c0_10 = arith.constant 0 : index
    %c0_11 = arith.constant 0 : index
    %12 = vector.load %arg5[%c0_10, %c0_11] : memref<32x128xf32, #tpu.memory_space<vmem>>, vector<32x128xf32>
    %c0_12 = arith.constant 0 : index
    %c0_13 = arith.constant 0 : index
    %13 = vector.load %arg2[%c0_12, %c0_13] : memref<8x1xi32, #tpu.memory_space<vmem>>, vector<8x1xi32>
    %c8_i32 = arith.constant 8 : i32
    %14 = arith.muli %arg1, %c8_i32 : i32
    %15 = tpu.iota {dimensions = array<i32: 1>} : vector<8x128xi32>
    %c64_i32 = arith.constant 64 : i32
    %16 = vector.broadcast %c64_i32 : i32 to vector<8x128xi32>
    %17 = arith.cmpi sge, %15, %16 : vector<8x128xi32>
    %c96_i32 = arith.constant 96 : i32
    %18 = vector.broadcast %c96_i32 : i32 to vector<8x128xi32>
    %19 = arith.cmpi slt, %15, %18 : vector<8x128xi32>
    %20 = arith.andi %17, %19 : vector<8x128xi1>
    %c0_14 = arith.constant 0 : index
    %c0_15 = arith.constant 0 : index
    %21 = vector.load %arg10[%c0_14, %c0_15] : memref<8x32xf32, #tpu.memory_space<vmem>>, vector<8x32xf32>
    %c0_16 = arith.constant 0 : index
    %c0_17 = arith.constant 0 : index
    %22 = vector.load %arg11[%c0_16, %c0_17] : memref<8x32xf32, #tpu.memory_space<vmem>>, vector<8x32xf32>
    %c0_i32_18 = arith.constant 0 : i32
    %23 = arith.index_cast %c0_i32_18 : i32 to index
    %c0_19 = arith.constant 0 : index
    %c0_20 = arith.constant 0 : index
    %24 = vector.load %arg12[%23, %c0_19, %c0_20] : memref<8x8x128xf32, #tpu.memory_space<vmem>>, vector<1x8x128xf32>
    %25 = vector.shape_cast %24 : vector<1x8x128xf32> to vector<8x128xf32>
    %cst_21 = arith.constant dense<0.000000e+00> : vector<8x128xf32>
    %26 = tpu.matmul %21, %12, %cst_21 {dimension_numbers = #tpu.dot_dimension_numbers<[1], [0], [0], [1], [0, 0, 1, 1], [], []>} : vector<8x32xf32>, vector<32x128xf32>, vector<8x128xf32> -> vector<8x128xf32>
    %27 = arith.addf %25, %26 : vector<8x128xf32>
    %28 = arith.negf %27 : vector<8x128xf32>
    %29 = math.exp %28 : vector<8x128xf32>
    %cst_22 = arith.constant 1.000000e+00 : f32
    %30 = vector.broadcast %cst_22 : f32 to vector<8x128xf32>
    %31 = arith.addf %30, %29 : vector<8x128xf32>
    %32 = arith.divf %30, %31 : vector<8x128xf32>
    %cst_23 = arith.constant 2.000000e+00 : f32
    %33 = vector.broadcast %cst_23 : f32 to vector<8x128xf32>
    %34 = arith.mulf %33, %32 : vector<8x128xf32>
    %cst_24 = arith.constant 1.000000e+00 : f32
    %35 = vector.broadcast %cst_24 : f32 to vector<8x128xf32>
    %36 = arith.subf %34, %35 : vector<8x128xf32>
    %37 = arith.select %20, %36, %32 : vector<8x128xi1>, vector<8x128xf32>
    %38 = vector.extract_strided_slice %37 {offsets = [0, 0], sizes = [8, 32], strides = [1, 1]} : vector<8x128xf32> to vector<8x32xf32>
    %39 = vector.extract_strided_slice %37 {offsets = [0, 32], sizes = [8, 32], strides = [1, 1]} : vector<8x128xf32> to vector<8x32xf32>
    %40 = vector.extract_strided_slice %37 {offsets = [0, 64], sizes = [8, 32], strides = [1, 1]} : vector<8x128xf32> to vector<8x32xf32>
    %41 = vector.extract_strided_slice %37 {offsets = [0, 96], sizes = [8, 32], strides = [1, 1]} : vector<8x128xf32> to vector<8x32xf32>
    %42 = arith.mulf %39, %22 : vector<8x32xf32>
    %43 = arith.mulf %38, %40 : vector<8x32xf32>
    %44 = arith.addf %42, %43 : vector<8x32xf32>
    %45 = math.tanh %44 : vector<8x32xf32>
    %46 = arith.mulf %41, %45 : vector<8x32xf32>
    %47 = arith.addi %14, %c0_i32_18 : i32
    %48 = vector.broadcast %47 : i32 to vector<8x1xi32>
    %49 = arith.cmpi slt, %48, %13 : vector<8x1xi32>
    %50 = vector.shape_cast %49 : vector<8x1xi1> to vector<8x1xi1>
    %51 = vector.broadcast %50 : vector<8x1xi1> to vector<8x32xi1>
    %52 = arith.select %51, %46, %21 : vector<8x32xi1>, vector<8x32xf32>
    %53 = vector.shape_cast %49 : vector<8x1xi1> to vector<8x1xi1>
    %54 = vector.broadcast %53 : vector<8x1xi1> to vector<8x32xi1>
    %55 = arith.select %54, %44, %22 : vector<8x32xi1>, vector<8x32xf32>
    %cst_25 = arith.constant 0.000000e+00 : f32
    %56 = vector.shape_cast %49 : vector<8x1xi1> to vector<8x1xi1>
    %57 = vector.broadcast %56 : vector<8x1xi1> to vector<8x32xi1>
    %58 = vector.broadcast %cst_25 : f32 to vector<8x32xf32>
    %59 = arith.select %57, %46, %58 : vector<8x32xi1>, vector<8x32xf32>
    %60 = arith.index_cast %c0_i32_18 : i32 to index
    %c0_26 = arith.constant 0 : index
    %c0_27 = arith.constant 0 : index
    %61 = vector.load %arg7[%60, %c0_26, %c0_27] : memref<8x8x32xf32, #tpu.memory_space<vmem>>, vector<1x8x32xf32>
    %62 = vector.shape_cast %61 : vector<1x8x32xf32> to vector<8x32xf32>
    %63 = vector.shape_cast %59 : vector<8x32xf32> to vector<1x8x32xf32>
    tpu.vector_store %arg7[%60, %c0_26, %c0_27], %63 {strides = array<i32>} : memref<8x8x32xf32, #tpu.memory_space<vmem>>, vector<1x8x32xf32>,
    %c1_i32 = arith.constant 1 : i32
    %64 = arith.index_cast %c1_i32 : i32 to index
    %c0_28 = arith.constant 0 : index
    %c0_29 = arith.constant 0 : index
    %65 = vector.load %arg12[%64, %c0_28, %c0_29] : memref<8x8x128xf32, #tpu.memory_space<vmem>>, vector<1x8x128xf32>
    %66 = vector.shape_cast %65 : vector<1x8x128xf32> to vector<8x128xf32>
    %cst_30 = arith.constant dense<0.000000e+00> : vector<8x128xf32>
    %67 = tpu.matmul %52, %12, %cst_30 {dimension_numbers = #tpu.dot_dimension_numbers<[1], [0], [0], [1], [0, 0, 1, 1], [], []>} : vector<8x32xf32>, vector<32x128xf32>, vector<8x128xf32> -> vector<8x128xf32>
    %68 = arith.addf %66, %67 : vector<8x128xf32>
    %69 = arith.negf %68 : vector<8x128xf32>
    %70 = math.exp %69 : vector<8x128xf32>
    %cst_31 = arith.constant 1.000000e+00 : f32
    %71 = vector.broadcast %cst_31 : f32 to vector<8x128xf32>
    %72 = arith.addf %71, %70 : vector<8x128xf32>
    %73 = arith.divf %71, %72 : vector<8x128xf32>
    %cst_32 = arith.constant 2.000000e+00 : f32
    %74 = vector.broadcast %cst_32 : f32 to vector<8x128xf32>
    %75 = arith.mulf %74, %73 : vector<8x128xf32>
    %cst_33 = arith.constant 1.000000e+00 : f32
    %76 = vector.broadcast %cst_33 : f32 to vector<8x128xf32>
    %77 = arith.subf %75, %76 : vector<8x128xf32>
    %78 = arith.select %20, %77, %73 : vector<8x128xi1>, vector<8x128xf32>
    %79 = vector.extract_strided_slice %78 {offsets = [0, 0], sizes = [8, 32], strides = [1, 1]} : vector<8x128xf32> to vector<8x32xf32>
    %80 = vector.extract_strided_slice %78 {offsets = [0, 32], sizes = [8, 32], strides = [1, 1]} : vector<8x128xf32> to vector<8x32xf32>
    %81 = vector.extract_strided_slice %78 {offsets = [0, 64], sizes = [8, 32], strides = [1, 1]} : vector<8x128xf32> to vector<8x32xf32>
    %82 = vector.extract_strided_slice %78 {offsets = [0, 96], sizes = [8, 32], strides = [1, 1]} : vector<8x128xf32> to vector<8x32xf32>
    %83 = arith.mulf %80, %55 : vector<8x32xf32>
    %84 = arith.mulf %79, %81 : vector<8x32xf32>
    %85 = arith.addf %83, %84 : vector<8x32xf32>
    %86 = math.tanh %85 : vector<8x32xf32>
    %87 = arith.mulf %82, %86 : vector<8x32xf32>
    %88 = arith.addi %14, %c1_i32 : i32
    %89 = vector.broadcast %88 : i32 to vector<8x1xi32>
    %90 = arith.cmpi slt, %89, %13 : vector<8x1xi32>
    %91 = vector.shape_cast %90 : vector<8x1xi1> to vector<8x1xi1>
    %92 = vector.broadcast %91 : vector<8x1xi1> to vector<8x32xi1>
    %93 = arith.select %92, %87, %52 : vector<8x32xi1>, vector<8x32xf32>
    %94 = vector.shape_cast %90 : vector<8x1xi1> to vector<8x1xi1>
    %95 = vector.broadcast %94 : vector<8x1xi1> to vector<8x32xi1>
    %96 = arith.select %95, %85, %55 : vector<8x32xi1>, vector<8x32xf32>
    %cst_34 = arith.constant 0.000000e+00 : f32
    %97 = vector.shape_cast %90 : vector<8x1xi1> to vector<8x1xi1>
    %98 = vector.broadcast %97 : vector<8x1xi1> to vector<8x32xi1>
    %99 = vector.broadcast %cst_34 : f32 to vector<8x32xf32>
    %100 = arith.select %98, %87, %99 : vector<8x32xi1>, vector<8x32xf32>
    %101 = arith.index_cast %c1_i32 : i32 to index
    %c0_35 = arith.constant 0 : index
    %c0_36 = arith.constant 0 : index
    %102 = vector.load %arg7[%101, %c0_35, %c0_36] : memref<8x8x32xf32, #tpu.memory_space<vmem>>, vector<1x8x32xf32>
    %103 = vector.shape_cast %102 : vector<1x8x32xf32> to vector<8x32xf32>
    %104 = vector.shape_cast %100 : vector<8x32xf32> to vector<1x8x32xf32>
    tpu.vector_store %arg7[%101, %c0_35, %c0_36], %104 {strides = array<i32>} : memref<8x8x32xf32, #tpu.memory_space<vmem>>, vector<1x8x32xf32>,
    %c2_i32 = arith.constant 2 : i32
    %105 = arith.index_cast %c2_i32 : i32 to index
    %c0_37 = arith.constant 0 : index
    %c0_38 = arith.constant 0 : index
    %106 = vector.load %arg12[%105, %c0_37, %c0_38] : memref<8x8x128xf32, #tpu.memory_space<vmem>>, vector<1x8x128xf32>
    %107 = vector.shape_cast %106 : vector<1x8x128xf32> to vector<8x128xf32>
    %cst_39 = arith.constant dense<0.000000e+00> : vector<8x128xf32>
    %108 = tpu.matmul %93, %12, %cst_39 {dimension_numbers = #tpu.dot_dimension_numbers<[1], [0], [0], [1], [0, 0, 1, 1], [], []>} : vector<8x32xf32>, vector<32x128xf32>, vector<8x128xf32> -> vector<8x128xf32>
    %109 = arith.addf %107, %108 : vector<8x128xf32>
    %110 = arith.negf %109 : vector<8x128xf32>
    %111 = math.exp %110 : vector<8x128xf32>
    %cst_40 = arith.constant 1.000000e+00 : f32
    %112 = vector.broadcast %cst_40 : f32 to vector<8x128xf32>
    %113 = arith.addf %112, %111 : vector<8x128xf32>
    %114 = arith.divf %112, %113 : vector<8x128xf32>
    %cst_41 = arith.constant 2.000000e+00 : f32
    %115 = vector.broadcast %cst_41 : f32 to vector<8x128xf32>
    %116 = arith.mulf %115, %114 : vector<8x128xf32>
    %cst_42 = arith.constant 1.000000e+00 : f32
    %117 = vector.broadcast %cst_42 : f32 to vector<8x128xf32>
    %118 = arith.subf %116, %117 : vector<8x128xf32>
    %119 = arith.select %20, %118, %114 : vector<8x128xi1>, vector<8x128xf32>
    %120 = vector.extract_strided_slice %119 {offsets = [0, 0], sizes = [8, 32], strides = [1, 1]} : vector<8x128xf32> to vector<8x32xf32>
    %121 = vector.extract_strided_slice %119 {offsets = [0, 32], sizes = [8, 32], strides = [1, 1]} : vector<8x128xf32> to vector<8x32xf32>
    %122 = vector.extract_strided_slice %119 {offsets = [0, 64], sizes = [8, 32], strides = [1, 1]} : vector<8x128xf32> to vector<8x32xf32>
    %123 = vector.extract_strided_slice %119 {offsets = [0, 96], sizes = [8, 32], strides = [1, 1]} : vector<8x128xf32> to vector<8x32xf32>
    %124 = arith.mulf %121, %96 : vector<8x32xf32>
    %125 = arith.mulf %120, %122 : vector<8x32xf32>
    %126 = arith.addf %124, %125 : vector<8x32xf32>
    %127 = math.tanh %126 : vector<8x32xf32>
    %128 = arith.mulf %123, %127 : vector<8x32xf32>
    %129 = arith.addi %14, %c2_i32 : i32
    %130 = vector.broadcast %129 : i32 to vector<8x1xi32>
    %131 = arith.cmpi slt, %130, %13 : vector<8x1xi32>
    %132 = vector.shape_cast %131 : vector<8x1xi1> to vector<8x1xi1>
    %133 = vector.broadcast %132 : vector<8x1xi1> to vector<8x32xi1>
    %134 = arith.select %133, %128, %93 : vector<8x32xi1>, vector<8x32xf32>
    %135 = vector.shape_cast %131 : vector<8x1xi1> to vector<8x1xi1>
    %136 = vector.broadcast %135 : vector<8x1xi1> to vector<8x32xi1>
    %137 = arith.select %136, %126, %96 : vector<8x32xi1>, vector<8x32xf32>
    %cst_43 = arith.constant 0.000000e+00 : f32
    %138 = vector.shape_cast %131 : vector<8x1xi1> to vector<8x1xi1>
    %139 = vector.broadcast %138 : vector<8x1xi1> to vector<8x32xi1>
    %140 = vector.broadcast %cst_43 : f32 to vector<8x32xf32>
    %141 = arith.select %139, %128, %140 : vector<8x32xi1>, vector<8x32xf32>
    %142 = arith.index_cast %c2_i32 : i32 to index
    %c0_44 = arith.constant 0 : index
    %c0_45 = arith.constant 0 : index
    %143 = vector.load %arg7[%142, %c0_44, %c0_45] : memref<8x8x32xf32, #tpu.memory_space<vmem>>, vector<1x8x32xf32>
    %144 = vector.shape_cast %143 : vector<1x8x32xf32> to vector<8x32xf32>
    %145 = vector.shape_cast %141 : vector<8x32xf32> to vector<1x8x32xf32>
    tpu.vector_store %arg7[%142, %c0_44, %c0_45], %145 {strides = array<i32>} : memref<8x8x32xf32, #tpu.memory_space<vmem>>, vector<1x8x32xf32>,
    %c3_i32 = arith.constant 3 : i32
    %146 = arith.index_cast %c3_i32 : i32 to index
    %c0_46 = arith.constant 0 : index
    %c0_47 = arith.constant 0 : index
    %147 = vector.load %arg12[%146, %c0_46, %c0_47] : memref<8x8x128xf32, #tpu.memory_space<vmem>>, vector<1x8x128xf32>
    %148 = vector.shape_cast %147 : vector<1x8x128xf32> to vector<8x128xf32>
    %cst_48 = arith.constant dense<0.000000e+00> : vector<8x128xf32>
    %149 = tpu.matmul %134, %12, %cst_48 {dimension_numbers = #tpu.dot_dimension_numbers<[1], [0], [0], [1], [0, 0, 1, 1], [], []>} : vector<8x32xf32>, vector<32x128xf32>, vector<8x128xf32> -> vector<8x128xf32>
    %150 = arith.addf %148, %149 : vector<8x128xf32>
    %151 = arith.negf %150 : vector<8x128xf32>
    %152 = math.exp %151 : vector<8x128xf32>
    %cst_49 = arith.constant 1.000000e+00 : f32
    %153 = vector.broadcast %cst_49 : f32 to vector<8x128xf32>
    %154 = arith.addf %153, %152 : vector<8x128xf32>
    %155 = arith.divf %153, %154 : vector<8x128xf32>
    %cst_50 = arith.constant 2.000000e+00 : f32
    %156 = vector.broadcast %cst_50 : f32 to vector<8x128xf32>
    %157 = arith.mulf %156, %155 : vector<8x128xf32>
    %cst_51 = arith.constant 1.000000e+00 : f32
    %158 = vector.broadcast %cst_51 : f32 to vector<8x128xf32>
    %159 = arith.subf %157, %158 : vector<8x128xf32>
    %160 = arith.select %20, %159, %155 : vector<8x128xi1>, vector<8x128xf32>
    %161 = vector.extract_strided_slice %160 {offsets = [0, 0], sizes = [8, 32], strides = [1, 1]} : vector<8x128xf32> to vector<8x32xf32>
    %162 = vector.extract_strided_slice %160 {offsets = [0, 32], sizes = [8, 32], strides = [1, 1]} : vector<8x128xf32> to vector<8x32xf32>
    %163 = vector.extract_strided_slice %160 {offsets = [0, 64], sizes = [8, 32], strides = [1, 1]} : vector<8x128xf32> to vector<8x32xf32>
    %164 = vector.extract_strided_slice %160 {offsets = [0, 96], sizes = [8, 32], strides = [1, 1]} : vector<8x128xf32> to vector<8x32xf32>
    %165 = arith.mulf %162, %137 : vector<8x32xf32>
    %166 = arith.mulf %161, %163 : vector<8x32xf32>
    %167 = arith.addf %165, %166 : vector<8x32xf32>
    %168 = math.tanh %167 : vector<8x32xf32>
    %169 = arith.mulf %164, %168 : vector<8x32xf32>
    %170 = arith.addi %14, %c3_i32 : i32
    %171 = vector.broadcast %170 : i32 to vector<8x1xi32>
    %172 = arith.cmpi slt, %171, %13 : vector<8x1xi32>
    %173 = vector.shape_cast %172 : vector<8x1xi1> to vector<8x1xi1>
    %174 = vector.broadcast %173 : vector<8x1xi1> to vector<8x32xi1>
    %175 = arith.select %174, %169, %134 : vector<8x32xi1>, vector<8x32xf32>
    %176 = vector.shape_cast %172 : vector<8x1xi1> to vector<8x1xi1>
    %177 = vector.broadcast %176 : vector<8x1xi1> to vector<8x32xi1>
    %178 = arith.select %177, %167, %137 : vector<8x32xi1>, vector<8x32xf32>
    %cst_52 = arith.constant 0.000000e+00 : f32
    %179 = vector.shape_cast %172 : vector<8x1xi1> to vector<8x1xi1>
    %180 = vector.broadcast %179 : vector<8x1xi1> to vector<8x32xi1>
    %181 = vector.broadcast %cst_52 : f32 to vector<8x32xf32>
    %182 = arith.select %180, %169, %181 : vector<8x32xi1>, vector<8x32xf32>
    %183 = arith.index_cast %c3_i32 : i32 to index
    %c0_53 = arith.constant 0 : index
    %c0_54 = arith.constant 0 : index
    %184 = vector.load %arg7[%183, %c0_53, %c0_54] : memref<8x8x32xf32, #tpu.memory_space<vmem>>, vector<1x8x32xf32>
    %185 = vector.shape_cast %184 : vector<1x8x32xf32> to vector<8x32xf32>
    %186 = vector.shape_cast %182 : vector<8x32xf32> to vector<1x8x32xf32>
    tpu.vector_store %arg7[%183, %c0_53, %c0_54], %186 {strides = array<i32>} : memref<8x8x32xf32, #tpu.memory_space<vmem>>, vector<1x8x32xf32>,
    %c4_i32 = arith.constant 4 : i32
    %187 = arith.index_cast %c4_i32 : i32 to index
    %c0_55 = arith.constant 0 : index
    %c0_56 = arith.constant 0 : index
    %188 = vector.load %arg12[%187, %c0_55, %c0_56] : memref<8x8x128xf32, #tpu.memory_space<vmem>>, vector<1x8x128xf32>
    %189 = vector.shape_cast %188 : vector<1x8x128xf32> to vector<8x128xf32>
    %cst_57 = arith.constant dense<0.000000e+00> : vector<8x128xf32>
    %190 = tpu.matmul %175, %12, %cst_57 {dimension_numbers = #tpu.dot_dimension_numbers<[1], [0], [0], [1], [0, 0, 1, 1], [], []>} : vector<8x32xf32>, vector<32x128xf32>, vector<8x128xf32> -> vector<8x128xf32>
    %191 = arith.addf %189, %190 : vector<8x128xf32>
    %192 = arith.negf %191 : vector<8x128xf32>
    %193 = math.exp %192 : vector<8x128xf32>
    %cst_58 = arith.constant 1.000000e+00 : f32
    %194 = vector.broadcast %cst_58 : f32 to vector<8x128xf32>
    %195 = arith.addf %194, %193 : vector<8x128xf32>
    %196 = arith.divf %194, %195 : vector<8x128xf32>
    %cst_59 = arith.constant 2.000000e+00 : f32
    %197 = vector.broadcast %cst_59 : f32 to vector<8x128xf32>
    %198 = arith.mulf %197, %196 : vector<8x128xf32>
    %cst_60 = arith.constant 1.000000e+00 : f32
    %199 = vector.broadcast %cst_60 : f32 to vector<8x128xf32>
    %200 = arith.subf %198, %199 : vector<8x128xf32>
    %201 = arith.select %20, %200, %196 : vector<8x128xi1>, vector<8x128xf32>
    %202 = vector.extract_strided_slice %201 {offsets = [0, 0], sizes = [8, 32], strides = [1, 1]} : vector<8x128xf32> to vector<8x32xf32>
    %203 = vector.extract_strided_slice %201 {offsets = [0, 32], sizes = [8, 32], strides = [1, 1]} : vector<8x128xf32> to vector<8x32xf32>
    %204 = vector.extract_strided_slice %201 {offsets = [0, 64], sizes = [8, 32], strides = [1, 1]} : vector<8x128xf32> to vector<8x32xf32>
    %205 = vector.extract_strided_slice %201 {offsets = [0, 96], sizes = [8, 32], strides = [1, 1]} : vector<8x128xf32> to vector<8x32xf32>
    %206 = arith.mulf %203, %178 : vector<8x32xf32>
    %207 = arith.mulf %202, %204 : vector<8x32xf32>
    %208 = arith.addf %206, %207 : vector<8x32xf32>
    %209 = math.tanh %208 : vector<8x32xf32>
    %210 = arith.mulf %205, %209 : vector<8x32xf32>
    %211 = arith.addi %14, %c4_i32 : i32
    %212 = vector.broadcast %211 : i32 to vector<8x1xi32>
    %213 = arith.cmpi slt, %212, %13 : vector<8x1xi32>
    %214 = vector.shape_cast %213 : vector<8x1xi1> to vector<8x1xi1>
    %215 = vector.broadcast %214 : vector<8x1xi1> to vector<8x32xi1>
    %216 = arith.select %215, %210, %175 : vector<8x32xi1>, vector<8x32xf32>
    %217 = vector.shape_cast %213 : vector<8x1xi1> to vector<8x1xi1>
    %218 = vector.broadcast %217 : vector<8x1xi1> to vector<8x32xi1>
    %219 = arith.select %218, %208, %178 : vector<8x32xi1>, vector<8x32xf32>
    %cst_61 = arith.constant 0.000000e+00 : f32
    %220 = vector.shape_cast %213 : vector<8x1xi1> to vector<8x1xi1>
    %221 = vector.broadcast %220 : vector<8x1xi1> to vector<8x32xi1>
    %222 = vector.broadcast %cst_61 : f32 to vector<8x32xf32>
    %223 = arith.select %221, %210, %222 : vector<8x32xi1>, vector<8x32xf32>
    %224 = arith.index_cast %c4_i32 : i32 to index
    %c0_62 = arith.constant 0 : index
    %c0_63 = arith.constant 0 : index
    %225 = vector.load %arg7[%224, %c0_62, %c0_63] : memref<8x8x32xf32, #tpu.memory_space<vmem>>, vector<1x8x32xf32>
    %226 = vector.shape_cast %225 : vector<1x8x32xf32> to vector<8x32xf32>
    %227 = vector.shape_cast %223 : vector<8x32xf32> to vector<1x8x32xf32>
    tpu.vector_store %arg7[%224, %c0_62, %c0_63], %227 {strides = array<i32>} : memref<8x8x32xf32, #tpu.memory_space<vmem>>, vector<1x8x32xf32>,
    %c5_i32 = arith.constant 5 : i32
    %228 = arith.index_cast %c5_i32 : i32 to index
    %c0_64 = arith.constant 0 : index
    %c0_65 = arith.constant 0 : index
    %229 = vector.load %arg12[%228, %c0_64, %c0_65] : memref<8x8x128xf32, #tpu.memory_space<vmem>>, vector<1x8x128xf32>
    %230 = vector.shape_cast %229 : vector<1x8x128xf32> to vector<8x128xf32>
    %cst_66 = arith.constant dense<0.000000e+00> : vector<8x128xf32>
    %231 = tpu.matmul %216, %12, %cst_66 {dimension_numbers = #tpu.dot_dimension_numbers<[1], [0], [0], [1], [0, 0, 1, 1], [], []>} : vector<8x32xf32>, vector<32x128xf32>, vector<8x128xf32> -> vector<8x128xf32>
    %232 = arith.addf %230, %231 : vector<8x128xf32>
    %233 = arith.negf %232 : vector<8x128xf32>
    %234 = math.exp %233 : vector<8x128xf32>
    %cst_67 = arith.constant 1.000000e+00 : f32
    %235 = vector.broadcast %cst_67 : f32 to vector<8x128xf32>
    %236 = arith.addf %235, %234 : vector<8x128xf32>
    %237 = arith.divf %235, %236 : vector<8x128xf32>
    %cst_68 = arith.constant 2.000000e+00 : f32
    %238 = vector.broadcast %cst_68 : f32 to vector<8x128xf32>
    %239 = arith.mulf %238, %237 : vector<8x128xf32>
    %cst_69 = arith.constant 1.000000e+00 : f32
    %240 = vector.broadcast %cst_69 : f32 to vector<8x128xf32>
    %241 = arith.subf %239, %240 : vector<8x128xf32>
    %242 = arith.select %20, %241, %237 : vector<8x128xi1>, vector<8x128xf32>
    %243 = vector.extract_strided_slice %242 {offsets = [0, 0], sizes = [8, 32], strides = [1, 1]} : vector<8x128xf32> to vector<8x32xf32>
    %244 = vector.extract_strided_slice %242 {offsets = [0, 32], sizes = [8, 32], strides = [1, 1]} : vector<8x128xf32> to vector<8x32xf32>
    %245 = vector.extract_strided_slice %242 {offsets = [0, 64], sizes = [8, 32], strides = [1, 1]} : vector<8x128xf32> to vector<8x32xf32>
    %246 = vector.extract_strided_slice %242 {offsets = [0, 96], sizes = [8, 32], strides = [1, 1]} : vector<8x128xf32> to vector<8x32xf32>
    %247 = arith.mulf %244, %219 : vector<8x32xf32>
    %248 = arith.mulf %243, %245 : vector<8x32xf32>
    %249 = arith.addf %247, %248 : vector<8x32xf32>
    %250 = math.tanh %249 : vector<8x32xf32>
    %251 = arith.mulf %246, %250 : vector<8x32xf32>
    %252 = arith.addi %14, %c5_i32 : i32
    %253 = vector.broadcast %252 : i32 to vector<8x1xi32>
    %254 = arith.cmpi slt, %253, %13 : vector<8x1xi32>
    %255 = vector.shape_cast %254 : vector<8x1xi1> to vector<8x1xi1>
    %256 = vector.broadcast %255 : vector<8x1xi1> to vector<8x32xi1>
    %257 = arith.select %256, %251, %216 : vector<8x32xi1>, vector<8x32xf32>
    %258 = vector.shape_cast %254 : vector<8x1xi1> to vector<8x1xi1>
    %259 = vector.broadcast %258 : vector<8x1xi1> to vector<8x32xi1>
    %260 = arith.select %259, %249, %219 : vector<8x32xi1>, vector<8x32xf32>
    %cst_70 = arith.constant 0.000000e+00 : f32
    %261 = vector.shape_cast %254 : vector<8x1xi1> to vector<8x1xi1>
    %262 = vector.broadcast %261 : vector<8x1xi1> to vector<8x32xi1>
    %263 = vector.broadcast %cst_70 : f32 to vector<8x32xf32>
    %264 = arith.select %262, %251, %263 : vector<8x32xi1>, vector<8x32xf32>
    %265 = arith.index_cast %c5_i32 : i32 to index
    %c0_71 = arith.constant 0 : index
    %c0_72 = arith.constant 0 : index
    %266 = vector.load %arg7[%265, %c0_71, %c0_72] : memref<8x8x32xf32, #tpu.memory_space<vmem>>, vector<1x8x32xf32>
    %267 = vector.shape_cast %266 : vector<1x8x32xf32> to vector<8x32xf32>
    %268 = vector.shape_cast %264 : vector<8x32xf32> to vector<1x8x32xf32>
    tpu.vector_store %arg7[%265, %c0_71, %c0_72], %268 {strides = array<i32>} : memref<8x8x32xf32, #tpu.memory_space<vmem>>, vector<1x8x32xf32>,
    %c6_i32 = arith.constant 6 : i32
    %269 = arith.index_cast %c6_i32 : i32 to index
    %c0_73 = arith.constant 0 : index
    %c0_74 = arith.constant 0 : index
    %270 = vector.load %arg12[%269, %c0_73, %c0_74] : memref<8x8x128xf32, #tpu.memory_space<vmem>>, vector<1x8x128xf32>
    %271 = vector.shape_cast %270 : vector<1x8x128xf32> to vector<8x128xf32>
    %cst_75 = arith.constant dense<0.000000e+00> : vector<8x128xf32>
    %272 = tpu.matmul %257, %12, %cst_75 {dimension_numbers = #tpu.dot_dimension_numbers<[1], [0], [0], [1], [0, 0, 1, 1], [], []>} : vector<8x32xf32>, vector<32x128xf32>, vector<8x128xf32> -> vector<8x128xf32>
    %273 = arith.addf %271, %272 : vector<8x128xf32>
    %274 = arith.negf %273 : vector<8x128xf32>
    %275 = math.exp %274 : vector<8x128xf32>
    %cst_76 = arith.constant 1.000000e+00 : f32
    %276 = vector.broadcast %cst_76 : f32 to vector<8x128xf32>
    %277 = arith.addf %276, %275 : vector<8x128xf32>
    %278 = arith.divf %276, %277 : vector<8x128xf32>
    %cst_77 = arith.constant 2.000000e+00 : f32
    %279 = vector.broadcast %cst_77 : f32 to vector<8x128xf32>
    %280 = arith.mulf %279, %278 : vector<8x128xf32>
    %cst_78 = arith.constant 1.000000e+00 : f32
    %281 = vector.broadcast %cst_78 : f32 to vector<8x128xf32>
    %282 = arith.subf %280, %281 : vector<8x128xf32>
    %283 = arith.select %20, %282, %278 : vector<8x128xi1>, vector<8x128xf32>
    %284 = vector.extract_strided_slice %283 {offsets = [0, 0], sizes = [8, 32], strides = [1, 1]} : vector<8x128xf32> to vector<8x32xf32>
    %285 = vector.extract_strided_slice %283 {offsets = [0, 32], sizes = [8, 32], strides = [1, 1]} : vector<8x128xf32> to vector<8x32xf32>
    %286 = vector.extract_strided_slice %283 {offsets = [0, 64], sizes = [8, 32], strides = [1, 1]} : vector<8x128xf32> to vector<8x32xf32>
    %287 = vector.extract_strided_slice %283 {offsets = [0, 96], sizes = [8, 32], strides = [1, 1]} : vector<8x128xf32> to vector<8x32xf32>
    %288 = arith.mulf %285, %260 : vector<8x32xf32>
    %289 = arith.mulf %284, %286 : vector<8x32xf32>
    %290 = arith.addf %288, %289 : vector<8x32xf32>
    %291 = math.tanh %290 : vector<8x32xf32>
    %292 = arith.mulf %287, %291 : vector<8x32xf32>
    %293 = arith.addi %14, %c6_i32 : i32
    %294 = vector.broadcast %293 : i32 to vector<8x1xi32>
    %295 = arith.cmpi slt, %294, %13 : vector<8x1xi32>
    %296 = vector.shape_cast %295 : vector<8x1xi1> to vector<8x1xi1>
    %297 = vector.broadcast %296 : vector<8x1xi1> to vector<8x32xi1>
    %298 = arith.select %297, %292, %257 : vector<8x32xi1>, vector<8x32xf32>
    %299 = vector.shape_cast %295 : vector<8x1xi1> to vector<8x1xi1>
    %300 = vector.broadcast %299 : vector<8x1xi1> to vector<8x32xi1>
    %301 = arith.select %300, %290, %260 : vector<8x32xi1>, vector<8x32xf32>
    %cst_79 = arith.constant 0.000000e+00 : f32
    %302 = vector.shape_cast %295 : vector<8x1xi1> to vector<8x1xi1>
    %303 = vector.broadcast %302 : vector<8x1xi1> to vector<8x32xi1>
    %304 = vector.broadcast %cst_79 : f32 to vector<8x32xf32>
    %305 = arith.select %303, %292, %304 : vector<8x32xi1>, vector<8x32xf32>
    %306 = arith.index_cast %c6_i32 : i32 to index
    %c0_80 = arith.constant 0 : index
    %c0_81 = arith.constant 0 : index
    %307 = vector.load %arg7[%306, %c0_80, %c0_81] : memref<8x8x32xf32, #tpu.memory_space<vmem>>, vector<1x8x32xf32>
    %308 = vector.shape_cast %307 : vector<1x8x32xf32> to vector<8x32xf32>
    %309 = vector.shape_cast %305 : vector<8x32xf32> to vector<1x8x32xf32>
    tpu.vector_store %arg7[%306, %c0_80, %c0_81], %309 {strides = array<i32>} : memref<8x8x32xf32, #tpu.memory_space<vmem>>, vector<1x8x32xf32>,
    %c7_i32 = arith.constant 7 : i32
    %310 = arith.index_cast %c7_i32 : i32 to index
    %c0_82 = arith.constant 0 : index
    %c0_83 = arith.constant 0 : index
    %311 = vector.load %arg12[%310, %c0_82, %c0_83] : memref<8x8x128xf32, #tpu.memory_space<vmem>>, vector<1x8x128xf32>
    %312 = vector.shape_cast %311 : vector<1x8x128xf32> to vector<8x128xf32>
    %cst_84 = arith.constant dense<0.000000e+00> : vector<8x128xf32>
    %313 = tpu.matmul %298, %12, %cst_84 {dimension_numbers = #tpu.dot_dimension_numbers<[1], [0], [0], [1], [0, 0, 1, 1], [], []>} : vector<8x32xf32>, vector<32x128xf32>, vector<8x128xf32> -> vector<8x128xf32>
    %314 = arith.addf %312, %313 : vector<8x128xf32>
    %315 = arith.negf %314 : vector<8x128xf32>
    %316 = math.exp %315 : vector<8x128xf32>
    %cst_85 = arith.constant 1.000000e+00 : f32
    %317 = vector.broadcast %cst_85 : f32 to vector<8x128xf32>
    %318 = arith.addf %317, %316 : vector<8x128xf32>
    %319 = arith.divf %317, %318 : vector<8x128xf32>
    %cst_86 = arith.constant 2.000000e+00 : f32
    %320 = vector.broadcast %cst_86 : f32 to vector<8x128xf32>
    %321 = arith.mulf %320, %319 : vector<8x128xf32>
    %cst_87 = arith.constant 1.000000e+00 : f32
    %322 = vector.broadcast %cst_87 : f32 to vector<8x128xf32>
    %323 = arith.subf %321, %322 : vector<8x128xf32>
    %324 = arith.select %20, %323, %319 : vector<8x128xi1>, vector<8x128xf32>
    %325 = vector.extract_strided_slice %324 {offsets = [0, 0], sizes = [8, 32], strides = [1, 1]} : vector<8x128xf32> to vector<8x32xf32>
    %326 = vector.extract_strided_slice %324 {offsets = [0, 32], sizes = [8, 32], strides = [1, 1]} : vector<8x128xf32> to vector<8x32xf32>
    %327 = vector.extract_strided_slice %324 {offsets = [0, 64], sizes = [8, 32], strides = [1, 1]} : vector<8x128xf32> to vector<8x32xf32>
    %328 = vector.extract_strided_slice %324 {offsets = [0, 96], sizes = [8, 32], strides = [1, 1]} : vector<8x128xf32> to vector<8x32xf32>
    %329 = arith.mulf %326, %301 : vector<8x32xf32>
    %330 = arith.mulf %325, %327 : vector<8x32xf32>
    %331 = arith.addf %329, %330 : vector<8x32xf32>
    %332 = math.tanh %331 : vector<8x32xf32>
    %333 = arith.mulf %328, %332 : vector<8x32xf32>
    %334 = arith.addi %14, %c7_i32 : i32
    %335 = vector.broadcast %334 : i32 to vector<8x1xi32>
    %336 = arith.cmpi slt, %335, %13 : vector<8x1xi32>
    %337 = vector.shape_cast %336 : vector<8x1xi1> to vector<8x1xi1>
    %338 = vector.broadcast %337 : vector<8x1xi1> to vector<8x32xi1>
    %339 = arith.select %338, %333, %298 : vector<8x32xi1>, vector<8x32xf32>
    %340 = vector.shape_cast %336 : vector<8x1xi1> to vector<8x1xi1>
    %341 = vector.broadcast %340 : vector<8x1xi1> to vector<8x32xi1>
    %342 = arith.select %341, %331, %301 : vector<8x32xi1>, vector<8x32xf32>
    %cst_88 = arith.constant 0.000000e+00 : f32
    %343 = vector.shape_cast %336 : vector<8x1xi1> to vector<8x1xi1>
    %344 = vector.broadcast %343 : vector<8x1xi1> to vector<8x32xi1>
    %345 = vector.broadcast %cst_88 : f32 to vector<8x32xf32>
    %346 = arith.select %344, %333, %345 : vector<8x32xi1>, vector<8x32xf32>
    %347 = arith.index_cast %c7_i32 : i32 to index
    %c0_89 = arith.constant 0 : index
    %c0_90 = arith.constant 0 : index
    %348 = vector.load %arg7[%347, %c0_89, %c0_90] : memref<8x8x32xf32, #tpu.memory_space<vmem>>, vector<1x8x32xf32>
    %349 = vector.shape_cast %348 : vector<1x8x32xf32> to vector<8x32xf32>
    %350 = vector.shape_cast %346 : vector<8x32xf32> to vector<1x8x32xf32>
    tpu.vector_store %arg7[%347, %c0_89, %c0_90], %350 {strides = array<i32>} : memref<8x8x32xf32, #tpu.memory_space<vmem>>, vector<1x8x32xf32>,
    %c8_i32_91 = arith.constant 8 : i32
    %c0_92 = arith.constant 0 : index
    %c0_93 = arith.constant 0 : index
    %351 = vector.load %arg10[%c0_92, %c0_93] : memref<8x32xf32, #tpu.memory_space<vmem>>, vector<8x32xf32>
    tpu.vector_store %arg10[%c0_92, %c0_93], %339 {strides = array<i32>} : memref<8x32xf32, #tpu.memory_space<vmem>>, vector<8x32xf32>,
    %c0_94 = arith.constant 0 : index
    %c0_95 = arith.constant 0 : index
    %352 = vector.load %arg11[%c0_94, %c0_95] : memref<8x32xf32, #tpu.memory_space<vmem>>, vector<8x32xf32>
    tpu.vector_store %arg11[%c0_94, %c0_95], %342 {strides = array<i32>} : memref<8x32xf32, #tpu.memory_space<vmem>>, vector<8x32xf32>,
    %c0_96 = arith.constant 0 : index
    %c0_97 = arith.constant 0 : index
    %353 = vector.load %arg8[%c0_96, %c0_97] : memref<8x32xf32, #tpu.memory_space<vmem>>, vector<8x32xf32>
    tpu.vector_store %arg8[%c0_96, %c0_97], %339 {strides = array<i32>} : memref<8x32xf32, #tpu.memory_space<vmem>>, vector<8x32xf32>,
    %c0_98 = arith.constant 0 : index
    %c0_99 = arith.constant 0 : index
    %354 = vector.load %arg9[%c0_98, %c0_99] : memref<8x32xf32, #tpu.memory_space<vmem>>, vector<8x32xf32>
    tpu.vector_store %arg9[%c0_98, %c0_99], %342 {strides = array<i32>} : memref<8x32xf32, #tpu.memory_space<vmem>>, vector<8x32xf32>,
    return
  }
  func.func @transform_0(%arg0: i32, %arg1: i32) -> (i32, i32) {
    %c0_i32 = arith.constant 0 : i32
    %c0_i32_0 = arith.constant 0 : i32
    return %arg0, %c0_i32 : i32, i32
  }
  func.func @transform_1(%arg0: i32, %arg1: i32) -> (i32, i32, i32) {
    %c0_i32 = arith.constant 0 : i32
    %c0_i32_0 = arith.constant 0 : i32
    return %arg1, %arg0, %c0_i32 : i32, i32, i32
  }
  func.func @transform_2(%arg0: i32, %arg1: i32) -> (i32, i32) {
    %c0_i32 = arith.constant 0 : i32
    %c0_i32_0 = arith.constant 0 : i32
    %c0_i32_1 = arith.constant 0 : i32
    return %c0_i32, %c0_i32_0 : i32, i32
  }
  func.func @transform_3(%arg0: i32, %arg1: i32) -> (i32, i32) {
    %c0_i32 = arith.constant 0 : i32
    %c0_i32_0 = arith.constant 0 : i32
    %c0_i32_1 = arith.constant 0 : i32
    return %c0_i32, %c0_i32_0 : i32, i32
  }
  func.func @transform_4(%arg0: i32, %arg1: i32) -> (i32, i32) {
    %c0_i32 = arith.constant 0 : i32
    %c0_i32_0 = arith.constant 0 : i32
    %c0_i32_1 = arith.constant 0 : i32
    return %c0_i32, %c0_i32_0 : i32, i32
  }
  func.func @transform_5(%arg0: i32, %arg1: i32) -> (i32, i32, i32) {
    %c0_i32 = arith.constant 0 : i32
    %c0_i32_0 = arith.constant 0 : i32
    return %arg1, %arg0, %c0_i32 : i32, i32, i32
  }
  func.func @transform_6(%arg0: i32, %arg1: i32) -> (i32, i32) {
    %c0_i32 = arith.constant 0 : i32
    %c0_i32_0 = arith.constant 0 : i32
    return %arg0, %c0_i32 : i32, i32
  }
  func.func @transform_7(%arg0: i32, %arg1: i32) -> (i32, i32) {
    %c0_i32 = arith.constant 0 : i32
    %c0_i32_0 = arith.constant 0 : i32
    return %arg0, %c0_i32 : i32, i32
  }
}

</mosaic_0001>

<bundles_post_ra>
// kernel: masked_lstm.1
= control target key start
LH: loop header
LB: loop body
LE: loop exit
PB: predicated region body
PF: predicated region fallthrough
CT: control target
= control target key end

     0   :  { %vm47_vm0 = vcmask 130048   ;;  %v1504_v0 = vmov 0.0|0.0   ;;  %vm1505_vm1 = vmmov 0   ;;  %v1506_v4 = vmov 0.0   ;;  %s1509_s17 = smov 32   ;;  %s1510_s20 = smov 96   ;;  %s1899_s2 = inlined_call_operand.vmem [shape: f32[16,128], index: 2, kind: input, shape index: {}]   ;;  %s1900_s3 = inlined_call_operand.vmem [shape: f32[32,128], index: 3, kind: input, shape index: {}]   ;;  %s1901_s1 = inlined_call_operand.vmem [shape: f32[8,8,16], index: 1, kind: input, shape index: {}]   ;;  %s1902_s4 = inlined_call_operand.vmem [shape: f32[1,128], index: 4, kind: input, shape index: {}]   ;;  %s1903_s0 = inlined_call_operand.vmem [shape: s32[8,1], index: 0, kind: input, shape index: {}]   ;;  %s1904_s5 = inlined_call_operand.vmem [shape: f32[8,8,32], index: 5, kind: output, shape index: {0}]   ;;  %s1905_s6 = inlined_call_operand.vmem [shape: f32[8,32], index: 6, kind: output, shape index: {1}]   ;;  %s1906_s7 = inlined_call_operand.vmem [shape: f32[8,32], index: 7, kind: output, shape index: {2}]  }
   0x1   :  { %1399 = vmatprep.subr.bf16.mxu1 %v1504_v0  ;;  %v38_v1 = vld [vmem:[%s1899_s2] sm:$0xff]  ;;  %v39_v2 = vld [vmem:[%s1899_s2 + $0x8] sm:$0xff]  ;;  %1315 = vmatprep.mubr.msk.f32.mxu1 %vm1505_vm1, %v1506_v4  ;;  %vm27_vm2 = vcmask 261120   ;;  %v187_v9 = vld [vmem:[%s1900_s3 + $0x10] sm:$0xff]  ;;  %v191_v24 = vlaneseq  ;;  %v1507_v26 = vmov 0  }
   0x2   :  { %v185_v3 = vld [vmem:[%s1900_s3] sm:$0xff]  ;;  %v1395_v5 = vpack.c.bf16 %v39_v2, %v38_v1  ;;  %v186_v6 = vld [vmem:[%s1900_s3 + $0x8] sm:$0xff]  ;;  %28 = vst.msk [vmem:[#allocation2] sm:$0xff] %vm27_vm2, %v1506_v4  ;;  %29 = vst.msk [vmem:[#allocation3] sm:$0xff] %vm27_vm2, %v1506_v4  ;;  %1454 = vset.pattern.permute.xlu1 %v1507_v26  ;;  %1455 = vset.pattern.permute.xlu0 %v1507_v26 }
   0x3   :  { %v30_v7 = vld [vmem:[%s1901_s1] sm:$0xff]  ;;  %v1573_v8 = vpack.c.bf16 %v186_v6, %v185_v3  ;;  %v188_v10 = vld [vmem:[%s1900_s3 + $0x18] sm:$0xff]  ;;  %v31_v11 = vld [vmem:[%s1901_s1 + $0x8] sm:$0xff]  ;;  %v192_v25 = vand.u32 127, %v191_v24 }
   0x4   :  { %1295 = vmatprep.mubr.msk.f32.mxu0 %vm47_vm0, %v30_v7  ;;  %1396 = vmatprep.subr.bf16.mxu0 %v1395_v5  ;;  %v1586_v12 = vpack.c.bf16 %v188_v10, %v187_v9  ;;  %v1607_v14 = vld [vmem:[%s1902_s4] ss:$0 sm:$0xff]  ;;  %s1508_s4 = smov 64   ;;  %v32_v3 = vld [vmem:[%s1901_s1 + $0x10] sm:$0xff]  ;;  %v35_v7 = vld [vmem:[%s1901_s1 + $0x28] sm:$0xff] }
   0x5   :  { %1401 = vmatpush3.bf16.msra.mxu1 %v1573_v8  ;;  %1398 = vmatpush3.bf16.msra.mxu0 %v1395_v5  ;;  %vm193_vm3 = vcmp.ge.s32.totalorder %v192_v25, 64  ;;  %vm194_vm4 = vcmp.lt.s32.totalorder %v192_v25, 96  ;;  %v1623_v33 = vld [vmem:[%s1903_s0] sm:$0xff]  ;;  %v33_v5 = vld [vmem:[%s1901_s1 + $0x18] sm:$0xff]  ;;  %v36_v9 = vld [vmem:[%s1901_s1 + $0x30] sm:$0xff] }
   0x6   :  { %1402 = vmatprep.subr.bf16.mxu1 %v1504_v0  ;;  %1411 = vmatprep.subr.bf16.mxu0 %v1504_v0  ;;  %vm1612_vm5 = vmand %vm193_vm3, %vm194_vm4  ;;  %vm1205_vm6 = vcmp.gt.s32.totalorder %v1623_v33, 0  ;;  %vm1209_vm8 = vcmp.gt.s32.totalorder %v1623_v33, 1  ;;  %v34_v6 = vld [vmem:[%s1901_s1 + $0x20] sm:$0xff]  ;;  %v37_v10 = vld [vmem:[%s1901_s1 + $0x38] sm:$0xff]  ;;  %vm1214_vm10 = vcmp.gt.s32.totalorder %v1623_v33, 2  ;;  %vm1219_vm12 = vcmp.gt.s32.totalorder %v1623_v33, 3 }
   0x7   :  { %v306_v36 = vsel %vm1205_vm6, 1, %v1507_v26  ;;  %v429_v59 = vsel %vm1209_vm8, 1, %v1507_v26  ;;  %vm1224_vm14 = vcmp.gt.s32.totalorder %v1623_v33, 4  ;;  %vm1234_vm3 = vcmp.gt.s32.totalorder %v1623_v33, 6 }
   0x8   :  { %1296 = vmatmul.mubr.msk.f32.vlgmr.msra.gmra.mrb[0].mxu0 %vm47_vm0, %v31_v11  ;;  %vm1239_vm6 = vcmp.gt.s32.totalorder %v1623_v33, 7 }
   0x9   :  { %1404 = vmatpush3.bf16.msra.mxu1 %v1586_v12  ;;  %v196_v13 = vld [vmem:[#allocation2] sm:$0xff]  ;;  %1413 = vmatpush3.bf16.msra.mxu0 %v1573_v8  ;;  %v197_v32 = vld [vmem:[#allocation3] sm:$0xff] }
   0xa   :  { %1405 = vmatprep.subr.bf16.mxu1 %v1504_v0  ;;  %1414 = vmatprep.subr.bf16.mxu0 %v1504_v0 }
   0xb   :  { %1298 = vmatprep.mubr.msk.f32.mxu0 %vm47_vm0, %v32_v3 }
   0xc   :  { %1316 = vmatmul.mubr.msk.f32.vlgmr.msra.gmra.mrb[0].mxu1 %vm27_vm2, %v196_v13  ;;  %1299 = vmatmul.mubr.msk.f32.gmra.mrb[2].mxu0 %vm47_vm0, %v33_v5 }
   0xd   :  { %1407 = vmatpush3.bf16.msra.mxu1 %v1573_v8  ;;  %1326 = vmatprep.mubr.msk.f32.mxu1 %vm1505_vm1, %v1506_v4 }
   0xe   :  { %1408 = vmatprep.subr.bf16.mxu1 %v1504_v0  ;;  %1416 = vmatpush3.bf16.msra.mxu0 %v1586_v12 }
   0xf   :  { %1423 = vmatprep.subr.bf16.mxu0 %v1504_v0  ;;  %1301 = vmatprep.mubr.msk.f32.mxu0 %vm47_vm0, %v34_v6 }
  0x10   :  { %1302 = vmatmul.mubr.msk.f32.gmra.mrb[4].mxu0 %vm47_vm0, %v35_v7 }
  0x11   :  { %1410 = vmatpush3.bf16.msra.mxu1 %v1586_v12  ;;  %1304 = vmatprep.mubr.msk.f32.mxu0 %vm47_vm0, %v36_v9 }
  0x12   :  { %1417 = vmatprep.subr.bf16.mxu1 %v1504_v0 }
  0x14   :  { %1305 = vmatmul.mubr.msk.f32.gmra.mrb[6].mxu0 %vm47_vm0, %v37_v10  ;;  %vm1229_vm0 = vcmp.gt.s32.totalorder %v1623_v33, 5 }
  0x15   :  { %1337 = vmatprep.mubr.msk.f32.mxu0 %vm1505_vm1, %v1506_v4 }
  0xdb   :  { %v1297_v15 = vpop.f32.mrb[0].mxu0 }
  0xdc   :  { %v138_v16 = vpop.f32.mrb[1].mxu0  ;;  %v144_v48 = vadd.f32 %v1297_v15, %v1607_v14 }
  0xdd   :  { %v139_v17 = vadd.f32 %v1607_v14, %v138_v16 }
  0xdf   :  { %v269_v18 = vpop.f32.mrb[0].mxu1 }
  0xe0   :  { %v273_v19 = vadd.f32 %v269_v18, %v139_v17  ;;  %v1317_v20 = vpop.f32.mrb[1].mxu1  ;;  %v1300_v18 = vpop.f32.mrb[2].mxu0 }
  0xe2   :  { %v1203_v21 = vmul.f32 -1.442695, %v273_v19  ;;  %v148_v19 = vpop.f32.mrb[3].mxu0 }
  0xe3   :  { %v1691_v20 = vpop.f32.mrb[4].mxu0  ;;  %v149_v25 = vadd.f32 %v1607_v14, %v148_v19 }
  0xe4   :  { %1456 = vpow2.f32 %v1203_v21  ;;  %v1693_v21 = vpop.f32.mrb[5].mxu0 }
  0xee   :  { %v1457_v22 = vpop.eup %1456 }
  0xef   :  { %v277_v23 = vadd.f32 1.0, %v1457_v22  ;;  %v1695_v22 = vpop.f32.mrb[6].mxu0 }
  0xf1   :  { %1458 = vrcp.f32 %v277_v23  ;;  %v1697_v23 = vpop.f32.mrb[7].mxu0 }
  0xfb   :  { %v1459_v27 = vpop.eup %1458 }
  0xfc   :  { %v280_v28 = vmul.f32 2.0, %v1459_v27 }
  0xfe   :  { %v1204_v30 = vadd.f32 -1.0, %v280_v28 }
 0x100   :  { %v282_v31 = vsel %vm1612_vm5, %v1204_v30, %v1459_v27 }
 0x101   :  { %289 = vrot.lane.b32.xlu0 %v282_v31, %s1508_s4 }
 0x105   :  { %284 = vrot.lane.b32.xlu0 %v197_v32, %s1509_s17 }
 0x173   :  { %v290_v34 = vpop.permute.xlu0 %289 }
 0x174   :  { %v292_v35 = vmul.f32 %v290_v34, %v282_v31 }
 0x176   :  { %294 = vrot.lane.b32.xlu1 %v292_v35, %s1509_s17 }
 0x177   :  { %v285_v37 = vpop.permute.xlu0 %284 }
 0x178   :  { %v287_v38 = vmul.f32 %v285_v37, %v282_v31 }
 0x17a   :  { %308 = vperm.xlu1 %1454, %v306_v36  }
 0x17e   :  { %311 = vrot.lane.b32.xlu1 %v196_v13, %s1510_s20 }
 0x1e8   :  { %v295_v39 = vpop.permute.xlu1 %294 }
 0x1e9   :  { %v297_v40 = vadd.f32 %v295_v39, %v287_v38  ;;  %v550_v39 = vsel %vm1214_vm10, 1, %v1507_v26 }
 0x1eb   :  { %1460 = vtanh.f32 %v297_v40 }
 0x1f5   :  { %v1461_v41 = vpop.eup %1460 }
 0x1f6   :  { %300 = vrot.lane.b32.xlu0 %v1461_v41, %s1508_s4 }
 0x1f9   :  { %v1630_v42 = vpop.permute.xlu1 %308 }
 0x1fa   :  { %vm310_vm7 = vcmp.eq.s32.totalorder %v1630_v42, 1 }
 0x1fb   :  { %v315_v62 = vsel %vm310_vm7, %v297_v40, %v285_v37 }
 0x1fd   :  { %v312_v44 = vpop.permute.xlu1 %311 }
 0x268   :  { %v301_v43 = vpop.permute.xlu0 %300 }
 0x269   :  { %v1632_v45 = vmul.f32 %v301_v43, %v282_v31 }
 0x26b   :  { %v314_v46 = vsel %vm310_vm7, %v1632_v45, %v312_v44 }
 0x26c   :  { %325 = vrot.lane.b32.xlu0 %v314_v46, %s1509_s17 }
 0x2de   :  { %v326_v47 = vpop.permute.xlu0 %325 }
 0x2df   :  { %1327 = vmatmul.mubr.msk.f32.vlgmr.msra.gmra.mrb[2].mxu1 %vm27_vm2, %v326_v47 }
 0x2e0   :  { %1419 = vmatpush3.bf16.msra.mxu1 %v1573_v8  ;;  %1348 = vmatprep.mubr.msk.f32.mxu1 %vm1505_vm1, %v1506_v4 }
 0x2e1   :  { %1420 = vmatprep.subr.bf16.mxu1 %v1504_v0 }
 0x2e4   :  { %1422 = vmatpush3.bf16.msra.mxu1 %v1586_v12 }
 0x2e5   :  { %1429 = vmatprep.subr.bf16.mxu1 %v1504_v0 }
 0x3b2   :  { %v395_v49 = vpop.f32.mrb[2].mxu1 }
 0x3b3   :  { %v399_v50 = vadd.f32 %v395_v49, %v144_v48  ;;  %v1328_v51 = vpop.f32.mrb[3].mxu1 }
 0x3b5   :  { %v1207_v52 = vmul.f32 -1.442695, %v399_v50 }
 0x3b7   :  { %1462 = vpow2.f32 %v1207_v52 }
 0x3c1   :  { %v1463_v53 = vpop.eup %1462 }
 0x3c2   :  { %v403_v54 = vadd.f32 1.0, %v1463_v53 }
 0x3c4   :  { %1464 = vrcp.f32 %v403_v54  ;;  %v154_v54 = vadd.f32 %v1300_v18, %v1607_v14 }
 0x3ce   :  { %v1465_v55 = vpop.eup %1464 }
 0x3cf   :  { %v406_v56 = vmul.f32 2.0, %v1465_v55 }
 0x3d1   :  { %v1208_v57 = vadd.f32 -1.0, %v406_v56 }
 0x3d3   :  { %v408_v58 = vsel %vm1612_vm5, %v1208_v57, %v1465_v55 }
 0x3d4   :  { %411 = vrot.lane.b32.xlu1 %v408_v58, %s1508_s4  ;;  %v409_v63 = vmul.f32 %v408_v58, %v315_v62 }
 0x3d8   :  { %431 = vperm.xlu1 %1454, %v429_v59  }
 0x446   :  { %v412_v60 = vpop.permute.xlu1 %411 }
 0x447   :  { %v414_v61 = vmul.f32 %v412_v60, %v408_v58 }
 0x449   :  { %416 = vrot.lane.b32.xlu0 %v414_v61, %s1509_s17 }
 0x457   :  { %v1682_v13 = vpop.permute.xlu1 %431 }
 0x458   :  { %vm433_vm9 = vcmp.eq.s32.totalorder %v1682_v13, 1 }
 0x4bb   :  { %v417_v1 = vpop.permute.xlu0 %416 }
 0x4bc   :  { %v419_v2 = vadd.f32 %v417_v1, %v409_v63 }
 0x4be   :  { %1466 = vtanh.f32 %v419_v2  ;;  %v435_v43 = vsel %vm433_vm9, %v419_v2, %v315_v62  ;;  %v671_v2 = vsel %vm1219_vm12, 1, %v1507_v26 }
 0x4c8   :  { %v1467_v11 = vpop.eup %1466 }
 0x4c9   :  { %422 = vrot.lane.b32.xlu0 %v1467_v11, %s1508_s4 }
 0x53b   :  { %v423_v15 = vpop.permute.xlu0 %422 }
 0x53c   :  { %v1684_v16 = vmul.f32 %v423_v15, %v408_v58 }
 0x53e   :  { %v434_v17 = vsel %vm433_vm9, %v1684_v16, %v314_v46 }
 0x53f   :  { %446 = vrot.lane.b32.xlu1 %v434_v17, %s1509_s17 }
 0x5b1   :  { %v447_v24 = vpop.permute.xlu1 %446 }
 0x5b2   :  { %1338 = vmatmul.mubr.msk.f32.vlgmr.msra.gmra.mrb[8].mxu0 %vm27_vm2, %v447_v24 }
 0x5b3   :  { %1425 = vmatpush3.bf16.msra.mxu0 %v1573_v8  ;;  %1359 = vmatprep.mubr.msk.f32.mxu0 %vm1505_vm1, %v1506_v4 }
 0x5b4   :  { %1426 = vmatprep.subr.bf16.mxu0 %v1504_v0 }
 0x5b7   :  { %1428 = vmatpush3.bf16.msra.mxu0 %v1586_v12 }
 0x5b8   :  { %1435 = vmatprep.subr.bf16.mxu0 %v1504_v0 }
 0x685   :  { %v516_v27 = vpop.f32.mrb[8].mxu0 }
 0x686   :  { %v520_v28 = vadd.f32 %v516_v27, %v149_v25  ;;  %v1339_v30 = vpop.f32.mrb[9].mxu0  ;;  %v159_v25 = vadd.f32 %v1607_v14, %v1693_v21  ;;  %v792_v21 = vsel %vm1224_vm14, 1, %v1507_v26 }
 0x688   :  { %v1212_v31 = vmul.f32 -1.442695, %v520_v28 }
 0x68a   :  { %1468 = vpow2.f32 %v1212_v31 }
 0x694   :  { %v1469_v32 = vpop.eup %1468 }
 0x695   :  { %v524_v34 = vadd.f32 1.0, %v1469_v32 }
 0x697   :  { %1470 = vrcp.f32 %v524_v34 }
 0x6a1   :  { %v1471_v35 = vpop.eup %1470 }
 0x6a2   :  { %v527_v36 = vmul.f32 2.0, %v1471_v35 }
 0x6a4   :  { %v1213_v37 = vadd.f32 -1.0, %v527_v36 }
 0x6a6   :  { %v529_v38 = vsel %vm1612_vm5, %v1213_v37, %v1471_v35 }
 0x6a7   :  { %532 = vrot.lane.b32.xlu0 %v529_v38, %s1508_s4  ;;  %v530_v44 = vmul.f32 %v529_v38, %v435_v43 }
 0x6ab   :  { %552 = vperm.xlu0 %1455, %v550_v39  }
 0x719   :  { %v533_v40 = vpop.permute.xlu0 %532 }
 0x71a   :  { %v535_v41 = vmul.f32 %v533_v40, %v529_v38 }
 0x71c   :  { %537 = vrot.lane.b32.xlu1 %v535_v41, %s1509_s17 }
 0x72a   :  { %v1716_v49 = vpop.permute.xlu0 %552 }
 0x72b   :  { %vm554_vm11 = vcmp.eq.s32.totalorder %v1716_v49, 1 }
 0x78e   :  { %v538_v46 = vpop.permute.xlu1 %537 }
 0x78f   :  { %v540_v47 = vadd.f32 %v538_v46, %v530_v44 }
 0x791   :  { %1472 = vtanh.f32 %v540_v47  ;;  %v556_v6 = vsel %vm554_vm11, %v540_v47, %v435_v43 }
 0x79b   :  { %v1473_v48 = vpop.eup %1472 }
 0x79c   :  { %543 = vrot.lane.b32.xlu1 %v1473_v48, %s1508_s4 }
 0x80e   :  { %v544_v50 = vpop.permute.xlu1 %543 }
 0x80f   :  { %v1718_v51 = vmul.f32 %v544_v50, %v529_v38 }
 0x811   :  { %v555_v52 = vsel %vm554_vm11, %v1718_v51, %v434_v17 }
 0x812   :  { %567 = vrot.lane.b32.xlu1 %v555_v52, %s1509_s17 }
 0x884   :  { %v568_v53 = vpop.permute.xlu1 %567 }
 0x885   :  { %1349 = vmatmul.mubr.msk.f32.vlgmr.msra.gmra.mrb[4].mxu1 %vm27_vm2, %v568_v53 }
 0x886   :  { %1431 = vmatpush3.bf16.msra.mxu1 %v1573_v8  ;;  %1370 = vmatprep.mubr.msk.f32.mxu1 %vm1505_vm1, %v1506_v4 }
 0x887   :  { %1432 = vmatprep.subr.bf16.mxu1 %v1504_v0 }
 0x88a   :  { %1434 = vmatpush3.bf16.msra.mxu1 %v1586_v12 }
 0x88b   :  { %1441 = vmatprep.subr.bf16.mxu1 %v1504_v0 }
 0x958   :  { %v637_v55 = vpop.f32.mrb[4].mxu1 }
 0x959   :  { %v641_v56 = vadd.f32 %v637_v55, %v154_v54  ;;  %v1350_v57 = vpop.f32.mrb[5].mxu1  ;;  %v164_v55 = vadd.f32 %v1691_v20, %v1607_v14 }
 0x95b   :  { %v1217_v58 = vmul.f32 -1.442695, %v641_v56 }
 0x95d   :  { %1474 = vpow2.f32 %v1217_v58 }
 0x967   :  { %v1475_v59 = vpop.eup %1474 }
 0x968   :  { %v645_v60 = vadd.f32 1.0, %v1475_v59 }
 0x96a   :  { %1476 = vrcp.f32 %v645_v60 }
 0x974   :  { %v1477_v61 = vpop.eup %1476 }
 0x975   :  { %v648_v62 = vmul.f32 2.0, %v1477_v61 }
 0x977   :  { %v1218_v63 = vadd.f32 -1.0, %v648_v62 }
 0x979   :  { %v650_v1 = vsel %vm1612_vm5, %v1218_v63, %v1477_v61 }
 0x97a   :  { %653 = vrot.lane.b32.xlu0 %v650_v1, %s1508_s4  ;;  %v651_v7 = vmul.f32 %v650_v1, %v556_v6 }
 0x97e   :  { %673 = vperm.xlu0 %1455, %v671_v2  }
 0x9ec   :  { %v654_v3 = vpop.permute.xlu0 %653 }
 0x9ed   :  { %v656_v5 = vmul.f32 %v654_v3, %v650_v1 }
 0x9ef   :  { %658 = vrot.lane.b32.xlu1 %v656_v5, %s1509_s17 }
 0x9fd   :  { %v1742_v15 = vpop.permute.xlu0 %673 }
 0x9fe   :  { %vm675_vm13 = vcmp.eq.s32.totalorder %v1742_v15, 1 }
 0xa61   :  { %v659_v9 = vpop.permute.xlu1 %658 }
 0xa62   :  { %v661_v10 = vadd.f32 %v659_v9, %v651_v7 }
 0xa64   :  { %1478 = vtanh.f32 %v661_v10  ;;  %v677_v41 = vsel %vm675_vm13, %v661_v10, %v556_v6 }
 0xa6e   :  { %v1479_v11 = vpop.eup %1478 }
 0xa6f   :  { %664 = vrot.lane.b32.xlu1 %v1479_v11, %s1508_s4 }
 0xae1   :  { %v665_v17 = vpop.permute.xlu1 %664 }
 0xae2   :  { %v1744_v18 = vmul.f32 %v665_v17, %v650_v1 }
 0xae4   :  { %v676_v19 = vsel %vm675_vm13, %v1744_v18, %v555_v52 }
 0xae5   :  { %688 = vrot.lane.b32.xlu0 %v676_v19, %s1509_s17 }
 0xb57   :  { %v689_v24 = vpop.permute.xlu0 %688 }
 0xb58   :  { %1360 = vmatmul.mubr.msk.f32.vlgmr.msra.gmra.mrb[10].mxu0 %vm27_vm2, %v689_v24 }
 0xb59   :  { %1437 = vmatpush3.bf16.msra.mxu0 %v1573_v8  ;;  %1381 = vmatprep.mubr.msk.f32.mxu0 %vm1505_vm1, %v1506_v4 }
 0xb5a   :  { %1438 = vmatprep.subr.bf16.mxu0 %v1504_v0 }
 0xb5d   :  { %1440 = vmatpush3.bf16.msra.mxu0 %v1586_v12 }
 0xc2b   :  { %v758_v27 = vpop.f32.mrb[10].mxu0 }
 0xc2c   :  { %v762_v28 = vadd.f32 %v758_v27, %v159_v25  ;;  %v1361_v30 = vpop.f32.mrb[11].mxu0 }
 0xc2e   :  { %v1222_v31 = vmul.f32 -1.442695, %v762_v28 }
 0xc30   :  { %1480 = vpow2.f32 %v1222_v31 }
 0xc3a   :  { %v1481_v32 = vpop.eup %1480 }
 0xc3b   :  { %v766_v34 = vadd.f32 1.0, %v1481_v32 }
 0xc3d   :  { %1482 = vrcp.f32 %v766_v34 }
 0xc47   :  { %v1483_v35 = vpop.eup %1482 }
 0xc48   :  { %v769_v36 = vmul.f32 2.0, %v1483_v35 }
 0xc4a   :  { %v1223_v37 = vadd.f32 -1.0, %v769_v36 }
 0xc4c   :  { %v771_v38 = vsel %vm1612_vm5, %v1223_v37, %v1483_v35 }
 0xc4d   :  { %774 = vrot.lane.b32.xlu1 %v771_v38, %s1508_s4  ;;  %v772_v43 = vmul.f32 %v771_v38, %v677_v41 }
 0xc51   :  { %794 = vperm.xlu1 %1454, %v792_v21  }
 0xcbf   :  { %v775_v39 = vpop.permute.xlu1 %774 }
 0xcc0   :  { %v777_v40 = vmul.f32 %v775_v39, %v771_v38 }
 0xcc2   :  { %779 = vrot.lane.b32.xlu0 %v777_v40, %s1509_s17 }
 0xcd0   :  { %v1768_v48 = vpop.permute.xlu1 %794 }
 0xcd1   :  { %vm796_vm15 = vcmp.eq.s32.totalorder %v1768_v48, 1 }
 0xd34   :  { %v780_v44 = vpop.permute.xlu0 %779 }
 0xd35   :  { %v782_v46 = vadd.f32 %v780_v44, %v772_v43 }
 0xd37   :  { %1484 = vtanh.f32 %v782_v46  ;;  %v798_v1 = vsel %vm796_vm15, %v782_v46, %v677_v41 }
 0xd41   :  { %v1485_v47 = vpop.eup %1484 }
 0xd42   :  { %785 = vrot.lane.b32.xlu0 %v1485_v47, %s1508_s4 }
 0xdb4   :  { %v786_v50 = vpop.permute.xlu0 %785 }
 0xdb5   :  { %v1770_v52 = vmul.f32 %v786_v50, %v771_v38 }
 0xdb7   :  { %v797_v53 = vsel %vm796_vm15, %v1770_v52, %v676_v19  ;;  %v169_v19 = vadd.f32 %v1607_v14, %v1697_v23  ;;  %v1034_v23 = vsel %vm1234_vm3, 1, %v1507_v26  ;;  %v799_v29 = vsel %vm796_vm15, %v1770_v52, 0.0 }
 0xdb8   :  { %809 = vrot.lane.b32.xlu1 %v797_v53, %s1509_s17 }
 0xe2a   :  { %v810_v54 = vpop.permute.xlu1 %809 }
 0xe2b   :  { %1371 = vmatmul.mubr.msk.f32.vlgmr.msra.gmra.mrb[6].mxu1 %vm27_vm2, %v810_v54  ;;  %v174_v54 = vadd.f32 %v1695_v22, %v1607_v14  ;;  %v1155_v14 = vsel %vm1239_vm6, 1, %v1507_v26  ;;  %v316_v22 = vsel %vm310_vm7, %v1632_v45, 0.0 }
 0xe2c   :  { %1443 = vmatpush3.bf16.msra.mxu1 %v1573_v8  ;;  %1392 = vmatprep.mubr.msk.f32.mxu1 %vm1505_vm1, %v1506_v4  ;;  %v913_v4 = vsel %vm1229_vm0, 1, %v1507_v26 }
 0xe2d   :  { %1444 = vmatprep.subr.bf16.mxu1 %v1504_v0 }
 0xe30   :  { %1446 = vmatpush3.bf16.msra.mxu1 %v1586_v12 }
 0xefe   :  { %v879_v56 = vpop.f32.mrb[6].mxu1 }
 0xeff   :  { %v883_v57 = vadd.f32 %v879_v56, %v164_v55  ;;  %v1372_v58 = vpop.f32.mrb[7].mxu1 }
 0xf01   :  { %v1227_v59 = vmul.f32 -1.442695, %v883_v57 }
 0xf03   :  { %1486 = vpow2.f32 %v1227_v59 }
 0xf0d   :  { %v1487_v60 = vpop.eup %1486 }
 0xf0e   :  { %v887_v61 = vadd.f32 1.0, %v1487_v60 }
 0xf10   :  { %1488 = vrcp.f32 %v887_v61 }
 0xf1a   :  { %v1489_v62 = vpop.eup %1488 }
 0xf1b   :  { %v890_v8 = vmul.f32 2.0, %v1489_v62 }
 0xf1d   :  { %v1228_v63 = vadd.f32 -1.0, %v890_v8 }
 0xf1f   :  { %v892_v0 = vsel %vm1612_vm5, %v1228_v63, %v1489_v62 }
 0xf20   :  { %895 = vrot.lane.b32.xlu0 %v892_v0, %s1508_s4  ;;  %v893_v2 = vmul.f32 %v892_v0, %v798_v1 }
 0xf24   :  { %915 = vperm.xlu0 %1455, %v913_v4  }
 0xf92   :  { %v896_v12 = vpop.permute.xlu0 %895 }
 0xf93   :  { %v898_v20 = vmul.f32 %v896_v12, %v892_v0 }
 0xf95   :  { %900 = vrot.lane.b32.xlu1 %v898_v20, %s1509_s17 }
 0xfa3   :  { %v1794_v7 = vpop.permute.xlu0 %915 }
 0xfa4   :  { %vm917_vm1 = vcmp.eq.s32.totalorder %v1794_v7, 1 }
0x1007   :  { %v901_v3 = vpop.permute.xlu1 %900 }
0x1008   :  { %v903_v5 = vadd.f32 %v901_v3, %v893_v2 }
0x100a   :  { %1490 = vtanh.f32 %v903_v5  ;;  %v919_v21 = vsel %vm917_vm1, %v903_v5, %v798_v1  ;;  %v436_v5 = vsel %vm433_vm9, %v1684_v16, 0.0 }
0x1014   :  { %v1491_v6 = vpop.eup %1490 }
0x1015   :  { %906 = vrot.lane.b32.xlu1 %v1491_v6, %s1508_s4  ;;  %v678_v6 = vsel %vm675_vm13, %v1744_v18, 0.0 }
0x1087   :  { %v907_v9 = vpop.permute.xlu1 %906 }
0x1088   :  { %v1796_v10 = vmul.f32 %v907_v9, %v892_v0  ;;  %v557_v0 = vsel %vm554_vm11, %v1718_v51, 0.0 }
0x108a   :  { %v918_v11 = vsel %vm917_vm1, %v1796_v10, %v797_v53  ;;  %v920_v9 = vsel %vm917_vm1, %v1796_v10, 0.0 }
0x108b   :  { %930 = vrot.lane.b32.xlu0 %v918_v11, %s1509_s17 }
0x10fd   :  { %v931_v17 = vpop.permute.xlu0 %930 }
0x10fe   :  { %1382 = vmatmul.mubr.msk.f32.vlgmr.msra.gmra.mrb[12].mxu0 %vm27_vm2, %v931_v17 }
0x11d1   :  { %v1000_v24 = vpop.f32.mrb[12].mxu0 }
0x11d2   :  { %v1004_v25 = vadd.f32 %v1000_v24, %v169_v19  ;;  %v1383_v27 = vpop.f32.mrb[13].mxu0 }
0x11d4   :  { %v1232_v28 = vmul.f32 -1.442695, %v1004_v25 }
0x11d6   :  { %1492 = vpow2.f32 %v1232_v28 }
0x11e0   :  { %v1493_v30 = vpop.eup %1492 }
0x11e1   :  { %v1008_v31 = vadd.f32 1.0, %v1493_v30 }
0x11e3   :  { %1494 = vrcp.f32 %v1008_v31 }
0x11ed   :  { %v1495_v32 = vpop.eup %1494 }
0x11ee   :  { %v1011_v34 = vmul.f32 2.0, %v1495_v32 }
0x11f0   :  { %v1233_v35 = vadd.f32 -1.0, %v1011_v34 }
0x11f2   :  { %v1013_v36 = vsel %vm1612_vm5, %v1233_v35, %v1495_v32 }
0x11f3   :  { %1016 = vrot.lane.b32.xlu1 %v1013_v36, %s1508_s4  ;;  %v1014_v39 = vmul.f32 %v1013_v36, %v919_v21 }
0x11f7   :  { %1036 = vperm.xlu1 %1454, %v1034_v23  }
0x1265   :  { %v1017_v37 = vpop.permute.xlu1 %1016 }
0x1266   :  { %v1019_v38 = vmul.f32 %v1017_v37, %v1013_v36 }
0x1268   :  { %1021 = vrot.lane.b32.xlu0 %v1019_v38, %s1509_s17 }
0x1276   :  { %v1037_v44 = vpop.permute.xlu1 %1036 }
0x1277   :  { %vm1038_vm4 = vcmp.eq.s32.totalorder %v1037_v44, 1 }
0x12da   :  { %v1022_v40 = vpop.permute.xlu0 %1021 }
0x12db   :  { %v1024_v41 = vadd.f32 %v1022_v40, %v1014_v39 }
0x12dd   :  { %1496 = vtanh.f32 %v1024_v41  ;;  %v1040_v52 = vsel %vm1038_vm4, %v1024_v41, %v919_v21 }
0x12e7   :  { %v1497_v43 = vpop.eup %1496 }
0x12e8   :  { %1027 = vrot.lane.b32.xlu0 %v1497_v43, %s1508_s4 }
0x135a   :  { %v1028_v46 = vpop.permute.xlu0 %1027 }
0x135b   :  { %v1030_v47 = vmul.f32 %v1028_v46, %v1013_v36 }
0x135d   :  { %v1039_v50 = vsel %vm1038_vm4, %v1030_v47, %v918_v11  ;;  %v1041_v26 = vsel %vm1038_vm4, %v1030_v47, 0.0 }
0x135e   :  { %1051 = vrot.lane.b32.xlu1 %v1039_v50, %s1509_s17 }
0x13d0   :  { %v1052_v53 = vpop.permute.xlu1 %1051 }
0x13d1   :  { %1393 = vmatmul.mubr.msk.f32.vlgmr.msra.gmra.mrb[8].mxu1 %vm27_vm2, %v1052_v53 }
0x14a4   :  { %v1121_v55 = vpop.f32.mrb[8].mxu1 }
0x14a5   :  { %v1125_v56 = vadd.f32 %v1121_v55, %v174_v54  ;;  %v1394_v57 = vpop.f32.mrb[9].mxu1 }
0x14a7   :  { %v1237_v58 = vmul.f32 -1.442695, %v1125_v56 }
0x14a9   :  { %1498 = vpow2.f32 %v1237_v58 }
0x14b3   :  { %v1499_v59 = vpop.eup %1498 }
0x14b4   :  { %v1129_v60 = vadd.f32 1.0, %v1499_v59 }
0x14b6   :  { %1500 = vrcp.f32 %v1129_v60 }
0x14c0   :  { %v1501_v61 = vpop.eup %1500 }
0x14c1   :  { %v1132_v62 = vmul.f32 2.0, %v1501_v61 }
0x14c3   :  { %v1238_v8 = vadd.f32 -1.0, %v1132_v62 }
0x14c5   :  { %v1134_v63 = vsel %vm1612_vm5, %v1238_v8, %v1501_v61 }
0x14c6   :  { %1137 = vrot.lane.b32.xlu0 %v1134_v63, %s1508_s4  ;;  %v1135_v12 = vmul.f32 %v1134_v63, %v1040_v52 }
0x14ca   :  { %1157 = vperm.xlu0 %1455, %v1155_v14  }
0x14ce   :  { %318 = vrot.lane.b32.xlu0 %v316_v22, %s1509_s17 }
0x14d2   :  { %559 = vrot.lane.b32.xlu0 %v557_v0, %s1509_s17 }
0x14d6   :  { %801 = vrot.lane.b32.xlu0 %v799_v29, %s1509_s17 }
0x14da   :  { %1043 = vrot.lane.b32.xlu0 %v1041_v26, %s1509_s17 }
0x1538   :  { %v1138_v33 = vpop.permute.xlu0 %1137 }
0x1539   :  { %v1140_v42 = vmul.f32 %v1138_v33, %v1134_v63 }
0x153b   :  { %1142 = vrot.lane.b32.xlu1 %v1140_v42, %s1509_s17 }
0x1549   :  { %v1158_v45 = vpop.permute.xlu0 %1157 }
0x154a   :  { %vm1159_vm5 = vcmp.eq.s32.totalorder %v1158_v45, 1 }
0x154d   :  { %v319_v4 = vpop.permute.xlu0 %318 }
0x154e   :  { %321 = vst.msk [vmem:[%s1904_s5] sm:$0xff] %vm27_vm2, %v319_v4 }
0x1551   :  { %v560_v49 = vpop.permute.xlu0 %559 }
0x1552   :  { %1215 = vst.msk [vmem:[%s1904_s5 + $0x10] sm:$0xff] %vm27_vm2, %v560_v49 }
0x1555   :  { %v802_v51 = vpop.permute.xlu0 %801 }
0x1556   :  { %1225 = vst.msk [vmem:[%s1904_s5 + $0x20] sm:$0xff] %vm27_vm2, %v802_v51 }
0x1559   :  { %v1044_v48 = vpop.permute.xlu0 %1043 }
0x155a   :  { %1235 = vst.msk [vmem:[%s1904_s5 + $0x30] sm:$0xff] %vm27_vm2, %v1044_v48 }
0x15ad   :  { %v1143_v20 = vpop.permute.xlu1 %1142 }
0x15ae   :  { %v1145_v1 = vadd.f32 %v1143_v20, %v1135_v12 }
0x15b0   :  { %1502 = vtanh.f32 %v1145_v1  ;;  %v1161_v2 = vsel %vm1159_vm5, %v1145_v1, %v1040_v52 }
0x15ba   :  { %v1503_v3 = vpop.eup %1502 }
0x15bb   :  { %1148 = vrot.lane.b32.xlu1 %v1503_v3, %s1508_s4 }
0x15bf   :  { %438 = vrot.lane.b32.xlu1 %v436_v5, %s1509_s17 }
0x15c3   :  { %680 = vrot.lane.b32.xlu1 %v678_v6, %s1509_s17 }
0x15c7   :  { %922 = vrot.lane.b32.xlu1 %v920_v9, %s1509_s17 }
0x162d   :  { %v1149_v11 = vpop.permute.xlu1 %1148 }
0x162e   :  { %v1151_v17 = vmul.f32 %v1149_v11, %v1134_v63 }
0x1630   :  { %v1162_v19 = vsel %vm1159_vm5, %v1151_v17, 0.0  ;;  %v1160_v24 = vsel %vm1159_vm5, %v1151_v17, %v1039_v50 }
0x1631   :  { %1164 = vrot.lane.b32.xlu1 %v1162_v19, %s1509_s17  ;;  %1170 = vrot.lane.b32.xlu0 %v1160_v24, %s1509_s17  ;;  %v439_v13 = vpop.permute.xlu1 %438 }
0x1632   :  { %1210 = vst.msk [vmem:[%s1904_s5 + $0x8] sm:$0xff] %vm27_vm2, %v439_v13 }
0x1635   :  { %1175 = vrot.lane.b32.xlu1 %v1161_v2, %s1510_s20  ;;  %v681_v16 = vpop.permute.xlu1 %680 }
0x1636   :  { %1220 = vst.msk [vmem:[%s1904_s5 + $0x18] sm:$0xff] %vm27_vm2, %v681_v16 }
0x1639   :  { %v923_v15 = vpop.permute.xlu1 %922 }
0x163a   :  { %1230 = vst.msk [vmem:[%s1904_s5 + $0x28] sm:$0xff] %vm27_vm2, %v923_v15 }
0x16a3   :  { %v1171_v18 = vpop.permute.xlu0 %1170  ;;  %v1165_v7 = vpop.permute.xlu1 %1164 }
0x16a4   :  { %1173 = vst.msk [vmem:[#allocation2] sm:$0xff] %vm27_vm2, %v1171_v18  ;;  %1179 = vst.msk [vmem:[%s1905_s6] sm:$0xff] %vm27_vm2, %v1171_v18 }
0x16a5   :  { %1240 = vst.msk [vmem:[%s1904_s5 + $0x38] sm:$0xff] %vm27_vm2, %v1165_v7 }
0x16a7   :  { %v1176_v10 = vpop.permute.xlu1 %1175 }
0x16a8   :  { %1178 = vst.msk [vmem:[#allocation3] sm:$0xff] %vm27_vm2, %v1176_v10  ;;  %1180 = vst.msk [vmem:[%s1906_s7] sm:$0xff] %vm27_vm2, %v1176_v10 }

</bundles_post_ra>
